<compile_context>
chip_gen: v6e
topology: v6e:2x2x1
jax: 0.10.0
libtpu: 0.0.40
codegen_flags: <defaults>
</compile_context>

<pallas_src>
import functools

import jax
import jax.numpy as jnp
import numpy as np
from jax import lax
from jax.experimental import pallas as pl
from jax.experimental.pallas import tpu as pltpu


# --------------------------- fused Pallas kernel ---------------------------- #

def _fused_subdisc_kernel(*refs, metas, apply_pool, t_in, t_pool,
                          neg_slope=0.1):
    """One whole sub-discriminator (optional AvgPool1d + all Conv1d layers).

    refs layout (per grid step = one batch element):
      inputs : x_ref, (w_0, b_0), ..., (w_{L-1}, b_{L-1})
      outputs: [pool_ref,]  f_0, ..., f_{L-1}      (features are NCT: (1,C,T))
      scratch: s_0, ..., s_{L-1}, [sp]
    metas[i] = (K, S, P, t_li, t_lo, c_in, c_out, act)
    Weights w_i are dense block-diagonal, flattened tap-major: (K_i*C_in_i, C_out_i);
    biases are (1, C_out_i).  s_i is the zero-halo staging input of layer i
    (time on sublanes), sp the pool staging.  All intermediates stay in VMEM.
    """
    n_layers = len(metas)
    pos = 0
    x_ref = refs[pos]; pos += 1
    wb = []
    for _ in range(n_layers):
        wb.append((refs[pos], refs[pos + 1]))
        pos += 2
    pool_ref = None
    if apply_pool:
        pool_ref = refs[pos]; pos += 1
    feat_refs = refs[pos:pos + n_layers]; pos += n_layers
    stage_refs = refs[pos:pos + n_layers]; pos += n_layers
    sp_ref = refs[pos] if apply_pool else None

    # ---- layer-0 input (optionally AvgPool1d(4, 2, pad=2)), VMEM resident ----
    if apply_pool:
        c0 = sp_ref.shape[1]
        zero2 = jnp.zeros((2, c0), jnp.float32)
        sp_ref[pl.ds(0, 2), :] = zero2                     # halo-only zeroing
        sp_ref[pl.ds(2 + t_in, 2), :] = zero2
        sp_ref[pl.ds(2, t_in), :] = x_ref[0, :, :]
        acc = sp_ref[pl.ds(0, t_pool, stride=2), :]        # stride-2 in-kernel
        for k in range(1, 4):
            acc = acc + sp_ref[pl.ds(k, t_pool, stride=2), :]
        cur = acc * 0.25                                   # count_include_pad=True
        pool_ref[0, :, :] = cur                            # next scale's input
    else:
        cur = x_ref[0, :, :]

    # ---- conv layers: one folded-tap matmul + one lane-dense store per layer --
    for i, (K, S, P, t_li, t_lo, c_in, c_out, act) in enumerate(metas):
        w_ref, b_ref = wb[i]
        s_ref = stage_refs[i]                              # (t_li + 2P, c_in)
        if P > 0:
            zero_p = jnp.zeros((P, c_in), jnp.float32)
            s_ref[pl.ds(0, P), :] = zero_p                 # halo-only zeroing
            s_ref[pl.ds(P + t_li, P), :] = zero_p
            s_ref[pl.ds(P, t_li), :] = cur
        else:
            s_ref[...] = cur

        if c_in == 1:
            # Degenerate contraction: K VPU outer-product taps (MXU would be idle).
            acc = None
            for k in range(K):
                idx = pl.ds(k, t_lo) if S == 1 else pl.ds(k, t_lo, stride=S)
                part = s_ref[idx, :] * w_ref[pl.ds(k, 1), :]   # (t_lo,1)*(1,c_out)
                acc = part if acc is None else acc + part
        else:
            # Fold K taps into ONE matmul: lhs (t_lo, K*c_in) vs (K*c_in, c_out).
            taps = [s_ref[(pl.ds(k, t_lo) if S == 1 else
                           pl.ds(k, t_lo, stride=S)), :] for k in range(K)]
            lhs = jnp.concatenate(taps, axis=1)
            acc = jnp.dot(lhs, w_ref[...], preferred_element_type=jnp.float32)

        acc = acc + b_ref[...]
        if act:
            acc = jnp.where(acc >= 0, acc, neg_slope * acc)    # LeakyReLU(0.1)
        # Lane-dense NCT store: time on the lane axis; transpose once per layer.
        feat_refs[i][0, :, :] = jnp.transpose(acc, (1, 0)).astype(
            feat_refs[i].dtype)
        cur = acc                                          # (t_lo, c_out) for next layer


# ------------------------------ JAX wrappers -------------------------------- #

def _expand_grouped_weight(w, groups):
    """PyTorch grouped Conv1d weight (C_out, C_in/g, K) -> dense block-diagonal
    tap-major weight (K, C_in, C_out) (zeros off the group blocks)."""
    c_out, cin_g, K = w.shape
    cout_g = c_out // groups
    c_in = cin_g * groups
    w_full = jnp.zeros((K, c_in, c_out), w.dtype)
    for g in range(groups):
        blk = jnp.transpose(w[g * cout_g:(g + 1) * cout_g], (2, 1, 0))
        w_full = w_full.at[:, g * cin_g:(g + 1) * cin_g,
                           g * cout_g:(g + 1) * cout_g].set(blk)
    return w_full


def _tile_padded_bytes(shape, itemsize=4):
    """VMEM footprint of a block including (8,128) tile padding."""
    s = tuple(int(d) for d in shape)
    if len(s) == 1:
        s = (1,) + s
    lead = int(np.prod(s[:-2])) if len(s) > 2 else 1
    rows = -(-s[-2] // 8) * 8
    cols = -(-s[-1] // 128) * 128
    return lead * rows * cols * itemsize


def fused_subdisc(x_ntc, params, kernel_sizes, strides, groups, apply_pool):
    """One sub-discriminator on (B, T, C_in0) channels-last waveform input in a
    single pallas_call.  Returns ([pooled_x (B,T',C_in0),] feat_0, ..., feat_{L-1})
    with feature maps already in PyTorch NCT layout (B, C_out, T_out)."""
    b, t_in, c_in0 = x_ntc.shape
    n_layers = len(params)
    ks = list(kernel_sizes) + [3]
    ss = list(strides) + [1]
    gs = list(groups) + [1]
    acts = [True] * (n_layers - 1) + [False]

    w_full, b_full = [], []
    for (w, bb), g, K in zip(params, gs, ks):
        wf = _expand_grouped_weight(w, g)                      # (K, c_in, c_out)
        w_full.append(wf.reshape(K * wf.shape[1], wf.shape[2]))  # (K*c_in, c_out)
        b_full.append(bb.reshape(1, -1))

    t_pool = (t_in + 2 * 2 - 4) // 2 + 1 if apply_pool else None
    t_cur = t_pool if apply_pool else t_in
    metas = []
    for i in range(n_layers):
        K, S = ks[i], ss[i]
        P = (K - 1) // 2
        kc, c_out = w_full[i].shape
        c_in = kc // K
        t_out = (t_cur + 2 * P - K) // S + 1
        metas.append((K, S, P, t_cur, t_out, c_in, c_out, acts[i]))
        t_cur = t_out
    metas = tuple(metas)

    inputs = [x_ntc]
    in_specs = [pl.BlockSpec((1, t_in, c_in0), lambda bi: (bi, 0, 0))]
    for i in range(n_layers):
        inputs.append(w_full[i])
        in_specs.append(pl.BlockSpec(w_full[i].shape, lambda bi: (0, 0)))
        inputs.append(b_full[i])
        in_specs.append(pl.BlockSpec(b_full[i].shape, lambda bi: (0, 0)))

    out_shapes, out_specs = [], []
    if apply_pool:
        out_shapes.append(jax.ShapeDtypeStruct((b, t_pool, c_in0), jnp.float32))
        out_specs.append(pl.BlockSpec((1, t_pool, c_in0), lambda bi: (bi, 0, 0)))
    for (K, S, P, t_li, t_lo, c_in, c_out, act) in metas:
        # NCT feature outputs: time on the lane axis (lane-dense stores).
        out_shapes.append(jax.ShapeDtypeStruct((b, c_out, t_lo), jnp.float32))
        out_specs.append(pl.BlockSpec((1, c_out, t_lo), lambda bi: (bi, 0, 0)))

    scratch = [pltpu.VMEM((t_li + 2 * P, c_in), jnp.float32)
               for (K, S, P, t_li, t_lo, c_in, c_out, act) in metas]
    if apply_pool:
        scratch.append(pltpu.VMEM((t_in + 4, c_in0), jnp.float32))

    # Explicit scoped-VMEM limit sized from the actual (tile-padded) residency.
    est = 2 * _tile_padded_bytes((1, t_in, c_in0))
    for i in range(n_layers):
        est += 2 * (_tile_padded_bytes(w_full[i].shape)
                    + _tile_padded_bytes(b_full[i].shape))
    for sd in out_shapes:
        est += 2 * _tile_padded_bytes((1,) + sd.shape[1:])
    est += sum(_tile_padded_bytes((m[3] + 2 * m[2], m[5])) for m in metas)
    if apply_pool:
        est += _tile_padded_bytes((t_in + 4, c_in0))
    vmem_limit = int(min(max(2 * est, 32 * 2**20), 64 * 2**20))

    kernel = functools.partial(_fused_subdisc_kernel, metas=metas,
                               apply_pool=apply_pool, t_in=t_in, t_pool=t_pool)

    return pl.pallas_call(
        kernel,
        out_shape=tuple(out_shapes),
        grid=(b,),
        in_specs=in_specs,
        out_specs=tuple(out_specs),
        scratch_shapes=scratch,
        compiler_params=pltpu.CompilerParams(
            dimension_semantics=("parallel",),
            vmem_limit_bytes=vmem_limit),
    )(*inputs)


# -------------------------- Module-level forward ---------------------------- #

def init_sub_disc_params(key, kernel_sizes, strides, groups, channels):
    params = []
    for i, K in enumerate(kernel_sizes):
        key, kw, kb = jax.random.split(key, 3)
        cin_g = channels[i] // groups[i]
        w = 0.1 * jax.random.normal(kw, (channels[i + 1], cin_g, K), jnp.float32)
        b = 0.01 * jax.random.normal(kb, (channels[i + 1],), jnp.float32)
        params.append((w, b))
    # final Conv1d(channels[-1] -> 1, k=3, s=1, p=1, groups=1)
    key, kw, kb = jax.random.split(key, 3)
    w = 0.1 * jax.random.normal(kw, (1, channels[-1], 3), jnp.float32)
    b = 0.01 * jax.random.normal(kb, (1,), jnp.float32)
    params.append((w, b))
    return params


def msd_forward(x_gt_nct, x_fake_nct, all_params, kernel_sizes, strides, groups):
    n = x_gt_nct.shape[0]
    # Batch gt & fake into one call per scale (same weights).
    x_nct = jnp.concatenate([x_gt_nct, x_fake_nct], axis=0)
    b, c0, t = x_nct.shape
    # Waveform enters the kernel channels-last (time on sublanes for the conv
    # staging); for mono audio (c0 == 1) this is a free reshape, no transpose.
    x = (jnp.reshape(x_nct, (b, t, 1)) if c0 == 1
         else jnp.transpose(x_nct, (0, 2, 1)))
    gt_outs, gt_feats, fk_outs, fk_feats = [], [], [], []
    for i, params in enumerate(all_params):
        apply_pool = i != 0
        res = fused_subdisc(x, params, kernel_sizes, strides, groups, apply_pool)
        if apply_pool:
            x = res[0]                 # pooled waveform feeds the next scale
            feats = list(res[1:])
        else:
            feats = list(res)
        # Feature maps are already NCT (PyTorch layout) straight from the kernel.
        gt_feats.append([f[:n] for f in feats])
        fk_feats.append([f[n:] for f in feats])
        gt_outs.append(feats[-1][:n])
        fk_outs.append(feats[-1][n:])
    return gt_outs, gt_feats, fk_outs, fk_feats


# ------------------------- pure-JAX reference (check) ----------------------- #

def _ref_conv(x_nct, w, b, stride, groups, padding):
    out = lax.conv_general_dilated(
        x_nct, w, window_strides=(stride,), padding=[(padding, padding)],
        dimension_numbers=("NCH", "OIH", "NCH"), feature_group_count=groups,
        precision=lax.Precision.HIGHEST)
    return out + b[None, :, None]


def _ref_leaky(x):
    return jnp.where(x >= 0, x, 0.1 * x)


def _ref_avgpool(x_nct):
    xpad = jnp.pad(x_nct, ((0, 0), (0, 0), (2, 2)))
    s = lax.reduce_window(xpad, 0.0, lax.add, (1, 1, 4), (1, 1, 2), "VALID")
    return s / 4.0


def _ref_sub_disc(x, params, kernel_sizes, strides, groups):
    feats = []
    for i, (w, b) in enumerate(params[:-1]):
        x = _ref_leaky(_ref_conv(x, w, b, strides[i], groups[i],
                                 (kernel_sizes[i] - 1) // 2))
        feats.append(x)
    w, b = params[-1]
    x = _ref_conv(x, w, b, 1, 1, 1)
    feats.append(x)
    return x, feats


def _ref_msd(x_gt, x_fake, all_params, kernel_sizes, strides, groups):
    gt_outs, gt_feats, fk_outs, fk_feats = [], [], [], []
    for i, params in enumerate(all_params):
        if i != 0:
            x_gt = _ref_avgpool(x_gt)
            x_fake = _ref_avgpool(x_fake)
        og, fg = _ref_sub_disc(x_gt, params, kernel_sizes, strides, groups)
        gt_outs.append(og); gt_feats.append(fg)
        of, ff = _ref_sub_disc(x_fake, params, kernel_sizes, strides, groups)
        fk_outs.append(of); fk_feats.append(ff)
    return gt_outs, gt_feats, fk_outs, fk_feats


# ----------------------------------- main ----------------------------------- #

if __name__ == "__main__":
    # Small synthetic config consistent with the module constructor.
    num_blocks = 3
    kernel_sizes = [5, 5, 3]
    strides = [1, 2, 1]
    groups = [1, 2, 4]
    channels = [1, 8, 16, 16]

    key = jax.random.PRNGKey(0)
    k_gt, k_fk, k_par = jax.random.split(key, 3)
    # PyTorch Conv1d input layout: (N, C, T)
    x_gt = jax.random.normal(k_gt, (2, 1, 64), jnp.float32)
    x_fake = jax.random.normal(k_fk, (2, 1, 64), jnp.float32)

    # One deterministic parameter set per sub-discriminator.
    all_params = []
    for i in range(num_blocks):
        k_par, sub = jax.random.split(k_par)
        all_params.append(
            init_sub_disc_params(sub, kernel_sizes, strides, groups, channels))

    out = msd_forward(x_gt, x_fake, all_params, kernel_sizes, strides, groups)
    out = jax.block_until_ready(out)

    # Correctness check against a pure-JAX reference.
    ref = _ref_msd(x_gt, x_fake, all_params, kernel_sizes, strides, groups)
    got_leaves = jax.tree_util.tree_leaves(out)
    want_leaves = jax.tree_util.tree_leaves(ref)
    assert len(got_leaves) == len(want_leaves)
    for got, want in zip(got_leaves, want_leaves):
        np.testing.assert_allclose(np.asarray(got), np.asarray(want),
                                   rtol=1e-2, atol=1e-2)

    print("KERNEL_OK")
</pallas_src>

<mosaic_0001>
module attributes {stable_mosaic.version = 11 : i64} {
  func.func @_fused_subdisc_kernel(%arg0: i32, %arg1: memref<1x64x1xf32, #tpu.memory_space<vmem>>, %arg2: memref<5x8xf32, #tpu.memory_space<vmem>>, %arg3: memref<1x8xf32, #tpu.memory_space<vmem>>, %arg4: memref<40x16xf32, #tpu.memory_space<vmem>>, %arg5: memref<1x16xf32, #tpu.memory_space<vmem>>, %arg6: memref<48x16xf32, #tpu.memory_space<vmem>>, %arg7: memref<1x16xf32, #tpu.memory_space<vmem>>, %arg8: memref<48x1xf32, #tpu.memory_space<vmem>>, %arg9: memref<1x1xf32, #tpu.memory_space<vmem>>, %arg10: memref<1x8x64xf32, #tpu.memory_space<vmem>>, %arg11: memref<1x16x32xf32, #tpu.memory_space<vmem>>, %arg12: memref<1x16x32xf32, #tpu.memory_space<vmem>>, %arg13: memref<1x1x32xf32, #tpu.memory_space<vmem>>, %arg14: memref<68x1xf32, #tpu.memory_space<vmem>>, %arg15: memref<68x8xf32, #tpu.memory_space<vmem>>, %arg16: memref<34x16xf32, #tpu.memory_space<vmem>>, %arg17: memref<34x16xf32, #tpu.memory_space<vmem>>) attributes {dimension_semantics = [#tpu.dimension_semantics<parallel>], iteration_bounds = array<i64: 4>, scalar_prefetch = 0 : i64, scratch_operands = 4 : i64, tpu.core_type = #tpu.core_type<tc>, window_params = [{transform_indices = @transform_0, window_bounds = array<i64: 1, 64, 1>}, {pipeline_mode = #tpu.pipeline_mode<synchronous>, transform_indices = @transform_1, window_bounds = array<i64: 5, 8>}, {pipeline_mode = #tpu.pipeline_mode<synchronous>, transform_indices = @transform_2, window_bounds = array<i64: 1, 8>}, {pipeline_mode = #tpu.pipeline_mode<synchronous>, transform_indices = @transform_3, window_bounds = array<i64: 40, 16>}, {pipeline_mode = #tpu.pipeline_mode<synchronous>, transform_indices = @transform_4, window_bounds = array<i64: 1, 16>}, {pipeline_mode = #tpu.pipeline_mode<synchronous>, transform_indices = @transform_5, window_bounds = array<i64: 48, 16>}, {pipeline_mode = #tpu.pipeline_mode<synchronous>, transform_indices = @transform_6, window_bounds = array<i64: 1, 16>}, {pipeline_mode = #tpu.pipeline_mode<synchronous>, transform_indices = @transform_7, window_bounds = array<i64: 48, 1>}, {pipeline_mode = #tpu.pipeline_mode<synchronous>, transform_indices = @transform_8, window_bounds = array<i64: 1, 1>}, {transform_indices = @transform_9, window_bounds = array<i64: 1, 8, 64>}, {transform_indices = @transform_10, window_bounds = array<i64: 1, 16, 32>}, {transform_indices = @transform_11, window_bounds = array<i64: 1, 16, 32>}, {transform_indices = @transform_12, window_bounds = array<i64: 1, 1, 32>}]} {
    %c0 = arith.constant 0 : index
    %c0_0 = arith.constant 0 : index
    %c0_1 = arith.constant 0 : index
    %0 = vector.load %arg1[%c0, %c0_0, %c0_1] : memref<1x64x1xf32, #tpu.memory_space<vmem>>, vector<1x64x1xf32>
    %1 = vector.shape_cast %0 : vector<1x64x1xf32> to vector<64x1xf32>
    %cst = arith.constant 0.000000e+00 : f32
    %2 = vector.broadcast %cst : f32 to vector<2x1xf32>
    %c0_2 = arith.constant 0 : index
    %c0_3 = arith.constant 0 : index
    %3 = vector.load %arg14[%c0_2, %c0_3] : memref<68x1xf32, #tpu.memory_space<vmem>>, vector<2x1xf32>
    tpu.vector_store %arg14[%c0_2, %c0_3], %2 {strides = array<i32>} : memref<68x1xf32, #tpu.memory_space<vmem>>, vector<2x1xf32>,
    %c66 = arith.constant 66 : index
    %c0_4 = arith.constant 0 : index
    %4 = vector.load %arg14[%c66, %c0_4] : memref<68x1xf32, #tpu.memory_space<vmem>>, vector<2x1xf32>
    tpu.vector_store %arg14[%c66, %c0_4], %2 {strides = array<i32>} : memref<68x1xf32, #tpu.memory_space<vmem>>, vector<2x1xf32>,
    %c2 = arith.constant 2 : index
    %c0_5 = arith.constant 0 : index
    %5 = vector.load %arg14[%c2, %c0_5] : memref<68x1xf32, #tpu.memory_space<vmem>>, vector<64x1xf32>
    tpu.vector_store %arg14[%c2, %c0_5], %1 {strides = array<i32>} : memref<68x1xf32, #tpu.memory_space<vmem>>, vector<64x1xf32>,
    %c0_6 = arith.constant 0 : index
    %c0_7 = arith.constant 0 : index
    %6 = vector.load %arg14[%c0_6, %c0_7] : memref<68x1xf32, #tpu.memory_space<vmem>>, vector<64x1xf32>
    %c0_8 = arith.constant 0 : index
    %c0_9 = arith.constant 0 : index
    %7 = vector.load %arg2[%c0_8, %c0_9] : memref<5x8xf32, #tpu.memory_space<vmem>>, vector<1x8xf32>
    %8 = vector.broadcast %6 : vector<64x1xf32> to vector<64x8xf32>
    %9 = vector.broadcast %7 : vector<1x8xf32> to vector<64x8xf32>
    %10 = arith.mulf %8, %9 : vector<64x8xf32>
    %c1 = arith.constant 1 : index
    %c0_10 = arith.constant 0 : index
    %11 = vector.load %arg14[%c1, %c0_10] : memref<68x1xf32, #tpu.memory_space<vmem>>, vector<64x1xf32>
    %c1_11 = arith.constant 1 : index
    %c0_12 = arith.constant 0 : index
    %12 = vector.load %arg2[%c1_11, %c0_12] : memref<5x8xf32, #tpu.memory_space<vmem>>, vector<1x8xf32>
    %13 = vector.broadcast %11 : vector<64x1xf32> to vector<64x8xf32>
    %14 = vector.broadcast %12 : vector<1x8xf32> to vector<64x8xf32>
    %15 = arith.mulf %13, %14 : vector<64x8xf32>
    %16 = arith.addf %10, %15 : vector<64x8xf32>
    %c2_13 = arith.constant 2 : index
    %c0_14 = arith.constant 0 : index
    %17 = vector.load %arg14[%c2_13, %c0_14] : memref<68x1xf32, #tpu.memory_space<vmem>>, vector<64x1xf32>
    %c2_15 = arith.constant 2 : index
    %c0_16 = arith.constant 0 : index
    %18 = vector.load %arg2[%c2_15, %c0_16] : memref<5x8xf32, #tpu.memory_space<vmem>>, vector<1x8xf32>
    %19 = vector.broadcast %17 : vector<64x1xf32> to vector<64x8xf32>
    %20 = vector.broadcast %18 : vector<1x8xf32> to vector<64x8xf32>
    %21 = arith.mulf %19, %20 : vector<64x8xf32>
    %22 = arith.addf %16, %21 : vector<64x8xf32>
    %c3 = arith.constant 3 : index
    %c0_17 = arith.constant 0 : index
    %23 = vector.load %arg14[%c3, %c0_17] : memref<68x1xf32, #tpu.memory_space<vmem>>, vector<64x1xf32>
    %c3_18 = arith.constant 3 : index
    %c0_19 = arith.constant 0 : index
    %24 = vector.load %arg2[%c3_18, %c0_19] : memref<5x8xf32, #tpu.memory_space<vmem>>, vector<1x8xf32>
    %25 = vector.broadcast %23 : vector<64x1xf32> to vector<64x8xf32>
    %26 = vector.broadcast %24 : vector<1x8xf32> to vector<64x8xf32>
    %27 = arith.mulf %25, %26 : vector<64x8xf32>
    %28 = arith.addf %22, %27 : vector<64x8xf32>
    %c4 = arith.constant 4 : index
    %c0_20 = arith.constant 0 : index
    %29 = vector.load %arg14[%c4, %c0_20] : memref<68x1xf32, #tpu.memory_space<vmem>>, vector<64x1xf32>
    %c4_21 = arith.constant 4 : index
    %c0_22 = arith.constant 0 : index
    %30 = vector.load %arg2[%c4_21, %c0_22] : memref<5x8xf32, #tpu.memory_space<vmem>>, vector<1x8xf32>
    %31 = vector.broadcast %29 : vector<64x1xf32> to vector<64x8xf32>
    %32 = vector.broadcast %30 : vector<1x8xf32> to vector<64x8xf32>
    %33 = arith.mulf %31, %32 : vector<64x8xf32>
    %34 = arith.addf %28, %33 : vector<64x8xf32>
    %c0_23 = arith.constant 0 : index
    %c0_24 = arith.constant 0 : index
    %35 = vector.load %arg3[%c0_23, %c0_24] : memref<1x8xf32, #tpu.memory_space<vmem>>, vector<1x8xf32>
    %36 = vector.broadcast %35 : vector<1x8xf32> to vector<64x8xf32>
    %37 = arith.addf %34, %36 : vector<64x8xf32>
    %cst_25 = arith.constant 0.000000e+00 : f32
    %38 = vector.broadcast %cst_25 : f32 to vector<64x8xf32>
    %39 = arith.cmpf oge, %37, %38 : vector<64x8xf32>
    %cst_26 = arith.constant 1.000000e-01 : f32
    %40 = vector.broadcast %cst_26 : f32 to vector<64x8xf32>
    %41 = arith.mulf %40, %37 : vector<64x8xf32>
    %42 = arith.select %39, %37, %41 : vector<64x8xi1>, vector<64x8xf32>
    %43 = tpu.transpose %42, [1, 0] : vector<64x8xf32> -> vector<8x64xf32>
    %c0_27 = arith.constant 0 : index
    %c0_28 = arith.constant 0 : index
    %c0_29 = arith.constant 0 : index
    %44 = vector.load %arg10[%c0_27, %c0_28, %c0_29] : memref<1x8x64xf32, #tpu.memory_space<vmem>>, vector<1x8x64xf32>
    %45 = vector.shape_cast %44 : vector<1x8x64xf32> to vector<8x64xf32>
    %46 = vector.shape_cast %43 : vector<8x64xf32> to vector<1x8x64xf32>
    tpu.vector_store %arg10[%c0_27, %c0_28, %c0_29], %46 {strides = array<i32>} : memref<1x8x64xf32, #tpu.memory_space<vmem>>, vector<1x8x64xf32>,
    %cst_30 = arith.constant 0.000000e+00 : f32
    %47 = vector.broadcast %cst_30 : f32 to vector<2x8xf32>
    %c0_31 = arith.constant 0 : index
    %c0_32 = arith.constant 0 : index
    %48 = vector.load %arg15[%c0_31, %c0_32] : memref<68x8xf32, #tpu.memory_space<vmem>>, vector<2x8xf32>
    tpu.vector_store %arg15[%c0_31, %c0_32], %47 {strides = array<i32>} : memref<68x8xf32, #tpu.memory_space<vmem>>, vector<2x8xf32>,
    %c66_33 = arith.constant 66 : index
    %c0_34 = arith.constant 0 : index
    %49 = vector.load %arg15[%c66_33, %c0_34] : memref<68x8xf32, #tpu.memory_space<vmem>>, vector<2x8xf32>
    tpu.vector_store %arg15[%c66_33, %c0_34], %47 {strides = array<i32>} : memref<68x8xf32, #tpu.memory_space<vmem>>, vector<2x8xf32>,
    %c2_35 = arith.constant 2 : index
    %c0_36 = arith.constant 0 : index
    %50 = vector.load %arg15[%c2_35, %c0_36] : memref<68x8xf32, #tpu.memory_space<vmem>>, vector<64x8xf32>
    tpu.vector_store %arg15[%c2_35, %c0_36], %42 {strides = array<i32>} : memref<68x8xf32, #tpu.memory_space<vmem>>, vector<64x8xf32>,
    %c0_37 = arith.constant 0 : index
    %c0_38 = arith.constant 0 : index
    %51 = tpu.strided_load %arg15[%c0_37, %c0_38] {strides = array<i32: 2, 1>} : memref<68x8xf32, #tpu.memory_space<vmem>>, vector<32x8xf32>
    %c1_39 = arith.constant 1 : index
    %c0_40 = arith.constant 0 : index
    %52 = tpu.strided_load %arg15[%c1_39, %c0_40] {strides = array<i32: 2, 1>} : memref<68x8xf32, #tpu.memory_space<vmem>>, vector<32x8xf32>
    %c2_41 = arith.constant 2 : index
    %c0_42 = arith.constant 0 : index
    %53 = tpu.strided_load %arg15[%c2_41, %c0_42] {strides = array<i32: 2, 1>} : memref<68x8xf32, #tpu.memory_space<vmem>>, vector<32x8xf32>
    %c3_43 = arith.constant 3 : index
    %c0_44 = arith.constant 0 : index
    %54 = tpu.strided_load %arg15[%c3_43, %c0_44] {strides = array<i32: 2, 1>} : memref<68x8xf32, #tpu.memory_space<vmem>>, vector<32x8xf32>
    %c4_45 = arith.constant 4 : index
    %c0_46 = arith.constant 0 : index
    %55 = tpu.strided_load %arg15[%c4_45, %c0_46] {strides = array<i32: 2, 1>} : memref<68x8xf32, #tpu.memory_space<vmem>>, vector<32x8xf32>
    %56 = tpu.concatenate %51, %52, %53, %54, %55 in 1 : vector<32x8xf32>, vector<32x8xf32>, vector<32x8xf32>, vector<32x8xf32>, vector<32x8xf32> -> vector<32x40xf32>
    %c0_47 = arith.constant 0 : index
    %c0_48 = arith.constant 0 : index
    %57 = vector.load %arg4[%c0_47, %c0_48] : memref<40x16xf32, #tpu.memory_space<vmem>>, vector<40x16xf32>
    %cst_49 = arith.constant dense<0.000000e+00> : vector<32x16xf32>
    %58 = tpu.matmul %56, %57, %cst_49 {dimension_numbers = #tpu.dot_dimension_numbers<[1], [0], [0], [1], [0, 0, 1, 1], [], []>} : vector<32x40xf32>, vector<40x16xf32>, vector<32x16xf32> -> vector<32x16xf32>
    %c0_50 = arith.constant 0 : index
    %c0_51 = arith.constant 0 : index
    %59 = vector.load %arg5[%c0_50, %c0_51] : memref<1x16xf32, #tpu.memory_space<vmem>>, vector<1x16xf32>
    %60 = vector.broadcast %59 : vector<1x16xf32> to vector<32x16xf32>
    %61 = arith.addf %58, %60 : vector<32x16xf32>
    %cst_52 = arith.constant 0.000000e+00 : f32
    %62 = vector.broadcast %cst_52 : f32 to vector<32x16xf32>
    %63 = arith.cmpf oge, %61, %62 : vector<32x16xf32>
    %cst_53 = arith.constant 1.000000e-01 : f32
    %64 = vector.broadcast %cst_53 : f32 to vector<32x16xf32>
    %65 = arith.mulf %64, %61 : vector<32x16xf32>
    %66 = arith.select %63, %61, %65 : vector<32x16xi1>, vector<32x16xf32>
    %67 = tpu.transpose %66, [1, 0] : vector<32x16xf32> -> vector<16x32xf32>
    %c0_54 = arith.constant 0 : index
    %c0_55 = arith.constant 0 : index
    %c0_56 = arith.constant 0 : index
    %68 = vector.load %arg11[%c0_54, %c0_55, %c0_56] : memref<1x16x32xf32, #tpu.memory_space<vmem>>, vector<1x16x32xf32>
    %69 = vector.shape_cast %68 : vector<1x16x32xf32> to vector<16x32xf32>
    %70 = vector.shape_cast %67 : vector<16x32xf32> to vector<1x16x32xf32>
    tpu.vector_store %arg11[%c0_54, %c0_55, %c0_56], %70 {strides = array<i32>} : memref<1x16x32xf32, #tpu.memory_space<vmem>>, vector<1x16x32xf32>,
    %cst_57 = arith.constant 0.000000e+00 : f32
    %71 = vector.broadcast %cst_57 : f32 to vector<1x16xf32>
    %c0_58 = arith.constant 0 : index
    %c0_59 = arith.constant 0 : index
    %72 = vector.load %arg16[%c0_58, %c0_59] : memref<34x16xf32, #tpu.memory_space<vmem>>, vector<1x16xf32>
    tpu.vector_store %arg16[%c0_58, %c0_59], %71 {strides = array<i32>} : memref<34x16xf32, #tpu.memory_space<vmem>>, vector<1x16xf32>,
    %c33 = arith.constant 33 : index
    %c0_60 = arith.constant 0 : index
    %73 = vector.load %arg16[%c33, %c0_60] : memref<34x16xf32, #tpu.memory_space<vmem>>, vector<1x16xf32>
    tpu.vector_store %arg16[%c33, %c0_60], %71 {strides = array<i32>} : memref<34x16xf32, #tpu.memory_space<vmem>>, vector<1x16xf32>,
    %c1_61 = arith.constant 1 : index
    %c0_62 = arith.constant 0 : index
    %74 = vector.load %arg16[%c1_61, %c0_62] : memref<34x16xf32, #tpu.memory_space<vmem>>, vector<32x16xf32>
    tpu.vector_store %arg16[%c1_61, %c0_62], %66 {strides = array<i32>} : memref<34x16xf32, #tpu.memory_space<vmem>>, vector<32x16xf32>,
    %c0_63 = arith.constant 0 : index
    %c0_64 = arith.constant 0 : index
    %75 = vector.load %arg16[%c0_63, %c0_64] : memref<34x16xf32, #tpu.memory_space<vmem>>, vector<32x16xf32>
    %c1_65 = arith.constant 1 : index
    %c0_66 = arith.constant 0 : index
    %76 = vector.load %arg16[%c1_65, %c0_66] : memref<34x16xf32, #tpu.memory_space<vmem>>, vector<32x16xf32>
    %c2_67 = arith.constant 2 : index
    %c0_68 = arith.constant 0 : index
    %77 = vector.load %arg16[%c2_67, %c0_68] : memref<34x16xf32, #tpu.memory_space<vmem>>, vector<32x16xf32>
    %78 = tpu.concatenate %75, %76, %77 in 1 : vector<32x16xf32>, vector<32x16xf32>, vector<32x16xf32> -> vector<32x48xf32>
    %c0_69 = arith.constant 0 : index
    %c0_70 = arith.constant 0 : index
    %79 = vector.load %arg6[%c0_69, %c0_70] : memref<48x16xf32, #tpu.memory_space<vmem>>, vector<48x16xf32>
    %cst_71 = arith.constant dense<0.000000e+00> : vector<32x16xf32>
    %80 = tpu.matmul %78, %79, %cst_71 {dimension_numbers = #tpu.dot_dimension_numbers<[1], [0], [0], [1], [0, 0, 1, 1], [], []>} : vector<32x48xf32>, vector<48x16xf32>, vector<32x16xf32> -> vector<32x16xf32>
    %c0_72 = arith.constant 0 : index
    %c0_73 = arith.constant 0 : index
    %81 = vector.load %arg7[%c0_72, %c0_73] : memref<1x16xf32, #tpu.memory_space<vmem>>, vector<1x16xf32>
    %82 = vector.broadcast %81 : vector<1x16xf32> to vector<32x16xf32>
    %83 = arith.addf %80, %82 : vector<32x16xf32>
    %cst_74 = arith.constant 0.000000e+00 : f32
    %84 = vector.broadcast %cst_74 : f32 to vector<32x16xf32>
    %85 = arith.cmpf oge, %83, %84 : vector<32x16xf32>
    %cst_75 = arith.constant 1.000000e-01 : f32
    %86 = vector.broadcast %cst_75 : f32 to vector<32x16xf32>
    %87 = arith.mulf %86, %83 : vector<32x16xf32>
    %88 = arith.select %85, %83, %87 : vector<32x16xi1>, vector<32x16xf32>
    %89 = tpu.transpose %88, [1, 0] : vector<32x16xf32> -> vector<16x32xf32>
    %c0_76 = arith.constant 0 : index
    %c0_77 = arith.constant 0 : index
    %c0_78 = arith.constant 0 : index
    %90 = vector.load %arg12[%c0_76, %c0_77, %c0_78] : memref<1x16x32xf32, #tpu.memory_space<vmem>>, vector<1x16x32xf32>
    %91 = vector.shape_cast %90 : vector<1x16x32xf32> to vector<16x32xf32>
    %92 = vector.shape_cast %89 : vector<16x32xf32> to vector<1x16x32xf32>
    tpu.vector_store %arg12[%c0_76, %c0_77, %c0_78], %92 {strides = array<i32>} : memref<1x16x32xf32, #tpu.memory_space<vmem>>, vector<1x16x32xf32>,
    %cst_79 = arith.constant 0.000000e+00 : f32
    %93 = vector.broadcast %cst_79 : f32 to vector<1x16xf32>
    %c0_80 = arith.constant 0 : index
    %c0_81 = arith.constant 0 : index
    %94 = vector.load %arg17[%c0_80, %c0_81] : memref<34x16xf32, #tpu.memory_space<vmem>>, vector<1x16xf32>
    tpu.vector_store %arg17[%c0_80, %c0_81], %93 {strides = array<i32>} : memref<34x16xf32, #tpu.memory_space<vmem>>, vector<1x16xf32>,
    %c33_82 = arith.constant 33 : index
    %c0_83 = arith.constant 0 : index
    %95 = vector.load %arg17[%c33_82, %c0_83] : memref<34x16xf32, #tpu.memory_space<vmem>>, vector<1x16xf32>
    tpu.vector_store %arg17[%c33_82, %c0_83], %93 {strides = array<i32>} : memref<34x16xf32, #tpu.memory_space<vmem>>, vector<1x16xf32>,
    %c1_84 = arith.constant 1 : index
    %c0_85 = arith.constant 0 : index
    %96 = vector.load %arg17[%c1_84, %c0_85] : memref<34x16xf32, #tpu.memory_space<vmem>>, vector<32x16xf32>
    tpu.vector_store %arg17[%c1_84, %c0_85], %88 {strides = array<i32>} : memref<34x16xf32, #tpu.memory_space<vmem>>, vector<32x16xf32>,
    %c0_86 = arith.constant 0 : index
    %c0_87 = arith.constant 0 : index
    %97 = vector.load %arg17[%c0_86, %c0_87] : memref<34x16xf32, #tpu.memory_space<vmem>>, vector<32x16xf32>
    %c1_88 = arith.constant 1 : index
    %c0_89 = arith.constant 0 : index
    %98 = vector.load %arg17[%c1_88, %c0_89] : memref<34x16xf32, #tpu.memory_space<vmem>>, vector<32x16xf32>
    %c2_90 = arith.constant 2 : index
    %c0_91 = arith.constant 0 : index
    %99 = vector.load %arg17[%c2_90, %c0_91] : memref<34x16xf32, #tpu.memory_space<vmem>>, vector<32x16xf32>
    %100 = tpu.concatenate %97, %98, %99 in 1 : vector<32x16xf32>, vector<32x16xf32>, vector<32x16xf32> -> vector<32x48xf32>
    %c0_92 = arith.constant 0 : index
    %c0_93 = arith.constant 0 : index
    %101 = vector.load %arg8[%c0_92, %c0_93] : memref<48x1xf32, #tpu.memory_space<vmem>>, vector<48x1xf32>
    %cst_94 = arith.constant dense<0.000000e+00> : vector<32x1xf32>
    %102 = tpu.matmul %100, %101, %cst_94 {dimension_numbers = #tpu.dot_dimension_numbers<[1], [0], [0], [1], [0, 0, 1, 1], [], []>} : vector<32x48xf32>, vector<48x1xf32>, vector<32x1xf32> -> vector<32x1xf32>
    %c0_95 = arith.constant 0 : index
    %c0_96 = arith.constant 0 : index
    %103 = vector.load %arg9[%c0_95, %c0_96] : memref<1x1xf32, #tpu.memory_space<vmem>>, vector<1x1xf32>
    %104 = vector.broadcast %103 : vector<1x1xf32> to vector<32x1xf32>
    %105 = arith.addf %102, %104 : vector<32x1xf32>
    %106 = tpu.transpose %105, [1, 0] : vector<32x1xf32> -> vector<1x32xf32>
    %c0_97 = arith.constant 0 : index
    %c0_98 = arith.constant 0 : index
    %c0_99 = arith.constant 0 : index
    %107 = vector.load %arg13[%c0_97, %c0_98, %c0_99] : memref<1x1x32xf32, #tpu.memory_space<vmem>>, vector<1x1x32xf32>
    %108 = vector.shape_cast %107 : vector<1x1x32xf32> to vector<1x32xf32>
    %109 = vector.shape_cast %106 : vector<1x32xf32> to vector<1x1x32xf32>
    tpu.vector_store %arg13[%c0_97, %c0_98, %c0_99], %109 {strides = array<i32>} : memref<1x1x32xf32, #tpu.memory_space<vmem>>, vector<1x1x32xf32>,
    return
  }
  func.func @transform_0(%arg0: i32) -> (i32, i32, i32) {
    %c0_i32 = arith.constant 0 : i32
    %c0_i32_0 = arith.constant 0 : i32
    %c0_i32_1 = arith.constant 0 : i32
    return %arg0, %c0_i32, %c0_i32_0 : i32, i32, i32
  }
  func.func @transform_1(%arg0: i32) -> (i32, i32) {
    %c0_i32 = arith.constant 0 : i32
    %c0_i32_0 = arith.constant 0 : i32
    %c0_i32_1 = arith.constant 0 : i32
    return %c0_i32, %c0_i32_0 : i32, i32
  }
  func.func @transform_2(%arg0: i32) -> (i32, i32) {
    %c0_i32 = arith.constant 0 : i32
    %c0_i32_0 = arith.constant 0 : i32
    %c0_i32_1 = arith.constant 0 : i32
    return %c0_i32, %c0_i32_0 : i32, i32
  }
  func.func @transform_3(%arg0: i32) -> (i32, i32) {
    %c0_i32 = arith.constant 0 : i32
    %c0_i32_0 = arith.constant 0 : i32
    %c0_i32_1 = arith.constant 0 : i32
    return %c0_i32, %c0_i32_0 : i32, i32
  }
  func.func @transform_4(%arg0: i32) -> (i32, i32) {
    %c0_i32 = arith.constant 0 : i32
    %c0_i32_0 = arith.constant 0 : i32
    %c0_i32_1 = arith.constant 0 : i32
    return %c0_i32, %c0_i32_0 : i32, i32
  }
  func.func @transform_5(%arg0: i32) -> (i32, i32) {
    %c0_i32 = arith.constant 0 : i32
    %c0_i32_0 = arith.constant 0 : i32
    %c0_i32_1 = arith.constant 0 : i32
    return %c0_i32, %c0_i32_0 : i32, i32
  }
  func.func @transform_6(%arg0: i32) -> (i32, i32) {
    %c0_i32 = arith.constant 0 : i32
    %c0_i32_0 = arith.constant 0 : i32
    %c0_i32_1 = arith.constant 0 : i32
    return %c0_i32, %c0_i32_0 : i32, i32
  }
  func.func @transform_7(%arg0: i32) -> (i32, i32) {
    %c0_i32 = arith.constant 0 : i32
    %c0_i32_0 = arith.constant 0 : i32
    %c0_i32_1 = arith.constant 0 : i32
    return %c0_i32, %c0_i32_0 : i32, i32
  }
  func.func @transform_8(%arg0: i32) -> (i32, i32) {
    %c0_i32 = arith.constant 0 : i32
    %c0_i32_0 = arith.constant 0 : i32
    %c0_i32_1 = arith.constant 0 : i32
    return %c0_i32, %c0_i32_0 : i32, i32
  }
  func.func @transform_9(%arg0: i32) -> (i32, i32, i32) {
    %c0_i32 = arith.constant 0 : i32
    %c0_i32_0 = arith.constant 0 : i32
    %c0_i32_1 = arith.constant 0 : i32
    return %arg0, %c0_i32, %c0_i32_0 : i32, i32, i32
  }
  func.func @transform_10(%arg0: i32) -> (i32, i32, i32) {
    %c0_i32 = arith.constant 0 : i32
    %c0_i32_0 = arith.constant 0 : i32
    %c0_i32_1 = arith.constant 0 : i32
    return %arg0, %c0_i32, %c0_i32_0 : i32, i32, i32
  }
  func.func @transform_11(%arg0: i32) -> (i32, i32, i32) {
    %c0_i32 = arith.constant 0 : i32
    %c0_i32_0 = arith.constant 0 : i32
    %c0_i32_1 = arith.constant 0 : i32
    return %arg0, %c0_i32, %c0_i32_0 : i32, i32, i32
  }
  func.func @transform_12(%arg0: i32) -> (i32, i32, i32) {
    %c0_i32 = arith.constant 0 : i32
    %c0_i32_0 = arith.constant 0 : i32
    %c0_i32_1 = arith.constant 0 : i32
    return %arg0, %c0_i32, %c0_i32_0 : i32, i32, i32
  }
}

</mosaic_0001>

<bundles_post_ra>
// kernel: tpu_custom_call.1
= control target key start
LH: loop header
LB: loop body
LE: loop exit
PB: predicated region body
PF: predicated region fallthrough
CT: control target
= control target key end

     0   :  { %s2752_s0 = inlined_call_operand.vmem [shape: f32[4,64,1], index: 0, kind: input, shape index: {}]   ;;  %s2753_s1 = inlined_call_operand.vmem [shape: f32[5,8], index: 1, kind: input, shape index: {}]   ;;  %s2754_s2 = inlined_call_operand.vmem [shape: f32[1,8], index: 2, kind: input, shape index: {}]   ;;  %s2755_s3 = inlined_call_operand.vmem [shape: f32[40,16], index: 3, kind: input, shape index: {}]   ;;  %s2756_s4 = inlined_call_operand.vmem [shape: f32[1,16], index: 4, kind: input, shape index: {}]   ;;  %s2757_s5 = inlined_call_operand.vmem [shape: f32[48,16], index: 5, kind: input, shape index: {}]   ;;  %s2758_s6 = inlined_call_operand.vmem [shape: f32[1,16], index: 6, kind: input, shape index: {}]   ;;  %s2759_s7 = inlined_call_operand.vmem [shape: f32[48,1], index: 7, kind: input, shape index: {}]   ;;  %s2760_s8 = inlined_call_operand.<no memory space> [shape: f32[1,1], index: 8, kind: input, shape index: {}]   ;;  %s2761_s9 = inlined_call_operand.hbm [shape: f32[4,8,64], index: 9, kind: output, shape index: {0}]   ;;  %s2762_s10 = inlined_call_operand.hbm [shape: f32[4,16,32], index: 10, kind: output, shape index: {1}]   ;;  %s2763_s11 = inlined_call_operand.hbm [shape: f32[4,16,32], index: 11, kind: output, shape index: {2}]   ;;  %s2764_s12 = inlined_call_operand.hbm [shape: f32[4,1,32], index: 12, kind: output, shape index: {3}]  }
   0x1   :  { %2769 = sst [smem:[#allocation17_spill]] %s2752_s0  ;;  %v18_v0 = vstv %s2760_s8 }
   0x2   :  { %2770 = sst [smem:[#allocation18_spill]] %s2753_s1  ;;  %19 = vst [vmem:[#allocation6] sm:$0x1] %v18_v0 }
   0x3   :  { %2771 = sst [smem:[#allocation19_spill]] %s2754_s2 }
   0x4   :  { %2772 = sst [smem:[#allocation20_spill]] %s2755_s3 }
   0x5   :  { %2773 = sst [smem:[#allocation21_spill]] %s2756_s4 }
   0x6   :  { %2774 = sst [smem:[#allocation22_spill]] %s2757_s5 }
   0x7   :  { %2775 = sst [smem:[#allocation23_spill]] %s2758_s6 }
   0x8   :  { %2776 = sst [smem:[#allocation24_spill]] %s2759_s7 }
   0x9   :  { %2777 = sst [smem:[#allocation25_spill]] %s2762_s10 }
   0xa   :  { %20 = vsyncpa [#allocation8], 0 }
   0xb   :  { %22 = vsyncpa [#allocation8 + $0x1], 0 }
   0xc   :  { %23 = vsyncpa [#allocation10], 0 }
   0xd   :  { %25 = vsyncpa [#allocation10 + $0x1], 0 }
   0xe   :  { %26 = vsyncpa [#allocation13], 0 }
   0xf   :  { %28 = vsyncpa [#allocation13 + $0x1], 0  ;;  %s2227_s23 = smov 0   ;;  %s2229_s24 = smov 0  }
  0x10   :  { %s2231_s25 = smov 0   ;;  %s2233_s26 = smov 0  }
  0x11 LB: > { %s2248_s8 = sadd.s32 4294967295, %s2146_s26   ;;  %s2765_s27 = sadd.s32 4294967294, %s2146_s26   ;;  %s2146_s26 = sphi %s2233_s26, %s2795_s26   ;;  %s2142_s25 = sphi %s2231_s25, %s2794_s25   ;;  %s2138_s24 = sphi %s2229_s24, %s2793_s24   ;;  %s2134_s23 = sphi %s2227_s23, %s2792_s23  }
  0x12   : > { %s2252_s28 = sadd.s32 1, %s2146_s26   ;;  %s235_s29 = sadd.s32 1, %s2142_s25 }
  0x13   : > { %s232_s30 = ssub.s32 %s2146_s26, %s2252_s28  ;;  %p245_p0 = scmp.ne.s32.totalorder %s2142_s25, %s2138_s24 }
  0x14   : > { %p233_p1 = scmp.eq.s32.totalorder %s232_s30, 0  ;;  %p246_p2 = scmp.eq.s32.totalorder %s2248_s8, 3 }
  0x15   : > { %p251_p3 = scmp.ne.s32.totalorder %s2138_s24, %s2134_s23  ;;  %p252_p4 = scmp.eq.s32.totalorder %s2765_s27, 3 }
  0x16   : > { %s2265_s13 = scalar_select %p233_p1, %s2142_s25, %s235_s29  }
  0x17   : > { %p2267_p5 = por %p246_p2, %p245_p0  ;;  %p2271_p6 = por %p252_p4, %p251_p3 }
  0x18   : > { %p1803_p7 = scmp.ge.s32.totalorder %s2146_s26, 1  ;;  %p380_p8 = scmp.lt.s32.totalorder %s2146_s26, 5 }
  0x1a   : > { %p381_p9 = pnand %p1803_p7, %p380_p8 }
  0x1b   : > { %p436_p10 = scmp.lt.s32.totalorder (!%p381_p9), %s2248_s8, 3  ;;  %s2780_s0 = sld [smem:[#allocation17_spill]] (!%p381_p9) }
  0x1c   : > { %384 = sbr.rel (%p381_p9) target bundleno = 1433 (0x599), region = 56  ;;  %s2781_s1 = sld [smem:[#allocation18_spill]] (!%p381_p9) }
  0x1d   : > { %s2782_s2 = sld [smem:[#allocation19_spill]] (!%p381_p9)  ;;  %s2151_s30 = smov (!%p381_p9), 16  }
  0x1e   : > { %s2783_s3 = sld [smem:[#allocation20_spill]] (!%p381_p9)  ;;  %s2152_s19 = smov (!%p381_p9), 24  }
  0x1f   : > { %s2784_s4 = sld [smem:[#allocation21_spill]] (!%p381_p9)  ;;  %s1584_s29 = sand.u32 (!%p381_p9), 1, %s2248_s8  }
  0x20   : > { %s2785_s5 = sld [smem:[#allocation22_spill]] (!%p381_p9) }
  0x21   : > { %vm449_vm0 = vcmask 1024   ;;  %v2148_v1 = vmov 0   ;;  %v2149_v2 = vmov 0.0   ;;  %s437_s16 = scalar_select %p436_p10, %s2248_s8, 3  ;;  %vm452_vm1 = vcmask 7168  }
  0x22   : > { %1999 = vset.pattern.permute.xlu1 %v2148_v1  ;;  %1998 = vset.pattern.permute.xlu0 %v2148_v1  ;;  %450 = vst.msk [vmem:[#allocation2] sm:$0x3] %vm449_vm0, %v2149_v2  ;;  %451 = vst.msk [vmem:[#allocation2 + $0x42] sm:$0x3] %vm449_vm0, %v2149_v2  ;;  %vm871_vm2 = vcmask 58368   ;;  %vm874_vm3 = vcmask 64512  }
  0x23   : > { %s1841_s17 = sshll.u32 %s437_s16, 6  ;;  %872 = vst.msk [vmem:[#allocation3] sm:$0x3] %vm871_vm2, %v2149_v2  ;;  %873 = vst.msk [vmem:[#allocation3 + $0x42] sm:$0x3] %vm871_vm2, %v2149_v2  ;;  %vm990_vm12 = vcmask 130048  }
  0x24   : > { %s440_s20 = scalar_lea.vmem %s2780_s0, %s1841_s17  ;;  %s2766_s17 = smov 8   ;;  %vm995_vm13 = vcmask 195584   ;;  %vm1000_vm14 = vcmask 261120   ;;  %vm1017_vm15 = vcmask 326656   ;;  %vm1161_vm0 = vcmask 122880  }
  0x25   : > { %v441_v3 = vld [vmem:[%s440_s20] sm:$0xff]  ;;  %v442_v4 = vld [vmem:[%s440_s20 + $0x8] sm:$0xff]  ;;  %v443_v5 = vld [vmem:[%s440_s20 + $0x10] sm:$0xff]  ;;  %1163 = vst.msk [vmem:[#allocation4 + $0x21] sm:$0x1] %vm1161_vm0, %v2149_v2  ;;  %s2786_s7 = sld [smem:[#allocation24_spill]] }
  0x26   : > { %453 = vst.msk [vmem:[#allocation2 + $0x2] sm:$0xff] %vm452_vm1, %v441_v3  ;;  %454 = vst.msk [vmem:[#allocation2 + $0xa] sm:$0xff] %vm452_vm1, %v442_v4  ;;  %v444_v6 = vld [vmem:[%s440_s20 + $0x18] sm:$0xff]  ;;  %v445_v7 = vld [vmem:[%s440_s20 + $0x20] sm:$0xff]  ;;  %s2787_s6 = sld [smem:[#allocation23_spill]]  ;;  %s2768_s16 = sshll.u32 %s2248_s8, 8 }
  0x27   : > { %455 = vst.msk [vmem:[#allocation2 + $0x12] sm:$0xff] %vm452_vm1, %v443_v5  ;;  %v446_v8 = vld [vmem:[%s440_s20 + $0x28] sm:$0xff]  ;;  %456 = vst.msk [vmem:[#allocation2 + $0x1a] sm:$0xff] %vm452_vm1, %v444_v6  ;;  %v447_v9 = vld [vmem:[%s440_s20 + $0x30] sm:$0xff]  ;;  %s2788_s10 = sld [smem:[#allocation25_spill]] }
  0x28   : > { %457 = vst.msk [vmem:[#allocation2 + $0x22] sm:$0xff] %vm452_vm1, %v445_v7  ;;  %458 = vst.msk [vmem:[#allocation2 + $0x2a] sm:$0xff] %vm452_vm1, %v446_v8  ;;  %v448_v10 = vld [vmem:[%s440_s20 + $0x38] sm:$0xff]  ;;  %s2153_s20 = smov 32  }
  0x29   : > { %459 = vst.msk [vmem:[#allocation2 + $0x32] sm:$0xff] %vm452_vm1, %v447_v9  ;;  %460 = vst.msk [vmem:[#allocation2 + $0x3a] sm:$0xff] %vm452_vm1, %v448_v10  ;;  %v2313_v10 = vld [vmem:[%s2781_s1 + $0x1] ss:$0 sm:$0xff] }
  0x2a   : > { %1162 = vst.msk [vmem:[#allocation4] sm:$0x1] %vm1161_vm0, %v2149_v2  ;;  %1377 = vst.msk [vmem:[#allocation5] sm:$0x1] %vm1161_vm0, %v2149_v2 }
  0x2b   : > { %1378 = vst.msk [vmem:[#allocation5 + $0x21] sm:$0x1] %vm1161_vm0, %v2149_v2  ;;  %v1225_v2 = vld [vmem:[%s2785_s5 + $0x28] sm:$0xff] }
  0x2c   : > { %1889 = vmatprep.subr.mxu1 %v1225_v2 }
  0x2d   : > { %v522_v11 = vld [vmem:[#allocation2 + $0x1] sm:$0xff]  ;;  %v523_v13 = vld [vmem:[#allocation2 + $0x9] sm:$0xff]  ;;  %1890 = vmatpush3.msra.mxu1 %v1225_v2 }
  0x2e   : > { %v461_v12 = vld [vmem:[#allocation2] sm:$0xff]  ;;  %533 = vperm.xlu1 %1999, %v522_v11   ;;  %v462_v14 = vld [vmem:[#allocation2 + $0x8] sm:$0xff]  ;;  %v464_v15 = vld [vmem:[#allocation2 + $0x18] sm:$0xff] }
  0x2f   : > { %472 = vperm.xlu0 %1998, %v461_v12   ;;  %v463_v16 = vld [vmem:[#allocation2 + $0x10] sm:$0xff]  ;;  %v525_v17 = vld [vmem:[#allocation2 + $0x19] sm:$0xff]  ;;  %v591_v20 = vld [vmem:[#allocation2 + $0x2] sm:$0xff] }
  0x30   : > { %v524_v18 = vld [vmem:[#allocation2 + $0x11] sm:$0xff]  ;;  %v594_v21 = vld [vmem:[#allocation2 + $0x1a] sm:$0xff]  ;;  %v466_v23 = vld [vmem:[#allocation2 + $0x28] sm:$0xff] }
  0x31   : > { %v592_v19 = vld [vmem:[#allocation2 + $0xa] sm:$0xff]  ;;  %v593_v22 = vld [vmem:[#allocation2 + $0x12] sm:$0xff]  ;;  %v465_v24 = vld [vmem:[#allocation2 + $0x20] sm:$0xff] }
  0x32   : > { %538 = vperm.xlu1 %1999, %v523_v13   ;;  %v527_v25 = vld [vmem:[#allocation2 + $0x29] sm:$0xff]  ;;  %v526_v26 = vld [vmem:[#allocation2 + $0x21] sm:$0xff]  ;;  %v468_v29 = vld [vmem:[#allocation2 + $0x38] sm:$0xff] }
  0x33   : > { %477 = vperm.xlu0 %1998, %v462_v14   ;;  %v661_v27 = vld [vmem:[#allocation2 + $0xb] sm:$0xff]  ;;  %v660_v28 = vld [vmem:[#allocation2 + $0x3] sm:$0xff]  ;;  %v529_v31 = vld [vmem:[#allocation2 + $0x39] sm:$0xff] }
  0x34   : > { %v467_v30 = vld [vmem:[#allocation2 + $0x30] sm:$0xff]  ;;  %v663_v33 = vld [vmem:[#allocation2 + $0x1b] sm:$0xff]  ;;  %v729_v38 = vld [vmem:[#allocation2 + $0x4] sm:$0xff] }
  0x35   : > { %v528_v32 = vld [vmem:[#allocation2 + $0x31] sm:$0xff]  ;;  %v595_v36 = vld [vmem:[#allocation2 + $0x22] sm:$0xff]  ;;  %v598_v39 = vld [vmem:[#allocation2 + $0x3a] sm:$0xff] }
  0x36   : > { %487 = vperm.xlu1 %1999, %v464_v15   ;;  %v662_v34 = vld [vmem:[#allocation2 + $0x13] sm:$0xff]  ;;  %v596_v35 = vld [vmem:[#allocation2 + $0x2a] sm:$0xff]  ;;  %v732_v41 = vld [vmem:[#allocation2 + $0x1c] sm:$0xff] }
  0x37   : > { %482 = vperm.xlu0 %1998, %v463_v16   ;;  %v730_v37 = vld [vmem:[#allocation2 + $0xc] sm:$0xff]  ;;  %v731_v42 = vld [vmem:[#allocation2 + $0x14] sm:$0xff]  ;;  %v664_v44 = vld [vmem:[#allocation2 + $0x23] sm:$0xff] }
  0x38   : > { %v597_v40 = vld [vmem:[#allocation2 + $0x32] sm:$0xff]  ;;  %v667_v45 = vld [vmem:[#allocation2 + $0x3b] sm:$0xff]  ;;  %v733_v48 = vld [vmem:[#allocation2 + $0x24] sm:$0xff] }
  0x39   : > { %v665_v43 = vld [vmem:[#allocation2 + $0x2b] sm:$0xff]  ;;  %v666_v46 = vld [vmem:[#allocation2 + $0x33] sm:$0xff]  ;;  %v736_v49 = vld [vmem:[#allocation2 + $0x3c] sm:$0xff] }
  0x3a   : > { %548 = vperm.xlu1 %1999, %v525_v17   ;;  %v734_v47 = vld [vmem:[#allocation2 + $0x2c] sm:$0xff]  ;;  %v735_v50 = vld [vmem:[#allocation2 + $0x34] sm:$0xff]  ;;  %v2318_v11 = vld [vmem:[%s2781_s1] ss:$0 sm:$0xff] }
  0x3b   : > { %543 = vperm.xlu0 %1998, %v524_v18   ;;  %v2323_v12 = vld [vmem:[%s2781_s1 + $0x2] ss:$0 sm:$0xff] }
  0x3e   : > { %607 = vperm.xlu1 %1999, %v592_v19   ;;  %v2332_v19 = vld [vmem:[%s2781_s1 + $0x3] ss:$0 sm:$0xff] }
  0x3f   : > { %602 = vperm.xlu0 %1998, %v591_v20  }
  0x42   : > { %617 = vperm.xlu1 %1999, %v594_v21  }
  0x43   : > { %612 = vperm.xlu0 %1998, %v593_v22  }
  0x46   : > { %497 = vperm.xlu1 %1999, %v466_v23  }
  0x47   : > { %492 = vperm.xlu0 %1998, %v465_v24  }
  0x4a   : > { %558 = vperm.xlu1 %1999, %v527_v25  }
  0x4b   : > { %553 = vperm.xlu0 %1998, %v526_v26  }
  0x4e   : > { %676 = vperm.xlu1 %1999, %v661_v27  }
  0x4f   : > { %671 = vperm.xlu0 %1998, %v660_v28   ;;  %v2341_v28 = vld [vmem:[%s2781_s1 + $0x4] ss:$0 sm:$0xff]  ;;  %s2154_s1 = smov [#allocation9]  }
  0x52   : > { %507 = vperm.xlu1 %1999, %v468_v29  }
  0x53   : > { %502 = vperm.xlu0 %1998, %v467_v30  }
  0x56   : > { %568 = vperm.xlu1 %1999, %v529_v31  }
  0x57   : > { %563 = vperm.xlu0 %1998, %v528_v32  }
  0x5a   : > { %686 = vperm.xlu1 %1999, %v663_v33  }
  0x5b   : > { %681 = vperm.xlu0 %1998, %v662_v34  }
  0x5e   : > { %627 = vperm.xlu1 %1999, %v596_v35  }
  0x5f   : > { %622 = vperm.xlu0 %1998, %v595_v36  }
  0x62   : > { %745 = vperm.xlu1 %1999, %v730_v37  }
  0x63   : > { %740 = vperm.xlu0 %1998, %v729_v38  }
  0x66   : > { %637 = vperm.xlu1 %1999, %v598_v39  }
  0x67   : > { %632 = vperm.xlu0 %1998, %v597_v40  }
  0x6a   : > { %755 = vperm.xlu1 %1999, %v732_v41  }
  0x6b   : > { %750 = vperm.xlu0 %1998, %v731_v42  }
  0x6e   : > { %696 = vperm.xlu1 %1999, %v665_v43   ;;  %v2354_v43 = vld [vmem:[%s2782_s2] ss:$0 sm:$0xff]  ;;  %s2004_s2 = sshll.u32 %s2154_s1, 4  ;;  %s2005_s2 = int_to_ptr.vmem [resolvable:$false] %s2004_s2 }
  0x6f   : > { %691 = vperm.xlu0 %1998, %v664_v44  }
  0x72   : > { %706 = vperm.xlu1 %1999, %v667_v45  }
  0x73   : > { %701 = vperm.xlu0 %1998, %v666_v46  }
  0x76   : > { %765 = vperm.xlu1 %1999, %v734_v47  }
  0x77   : > { %760 = vperm.xlu0 %1998, %v733_v48  }
  0x7a   : > { %775 = vperm.xlu1 %1999, %v736_v49  }
  0x7b   : > { %770 = vperm.xlu0 %1998, %v735_v50  }
  0xa9   : > { %v534_v51 = vpop.permute.xlu1 %533 }
  0xaa   : > { %v473_v52 = vpop.permute.xlu0 %472  ;;  %v575_v15 = vmul.f32 %v2313_v10, %v534_v51 }
  0xab   : > { %v514_v16 = vmul.f32 %v2318_v11, %v473_v52 }
  0xad   : > { %v539_v53 = vpop.permute.xlu1 %538  ;;  %v583_v24 = vadd.f32 %v575_v15, %v514_v16 }
  0xae   : > { %v478_v54 = vpop.permute.xlu0 %477  ;;  %v576_v17 = vmul.f32 %v2313_v10, %v539_v53 }
  0xaf   : > { %v515_v18 = vmul.f32 %v2318_v11, %v478_v54 }
  0xb1   : > { %v488_v55 = vpop.permute.xlu1 %487  ;;  %v584_v25 = vadd.f32 %v576_v17, %v515_v18 }
  0xb2   : > { %v483_v56 = vpop.permute.xlu0 %482  ;;  %v517_v39 = vmul.f32 %v2318_v11, %v488_v55 }
  0xb3   : > { %v516_v40 = vmul.f32 %v2318_v11, %v483_v56 }
  0xb5   : > { %v549_v57 = vpop.permute.xlu1 %548 }
  0xb6   : > { %v544_v58 = vpop.permute.xlu0 %543  ;;  %v578_v31 = vmul.f32 %v2313_v10, %v549_v57 }
  0xb7   : > { %v577_v32 = vmul.f32 %v2313_v10, %v544_v58 }
  0xb8   : > { %v586_v46 = vadd.f32 %v578_v31, %v517_v39 }
  0xb9   : > { %v608_v59 = vpop.permute.xlu1 %607  ;;  %v585_v47 = vadd.f32 %v577_v32, %v516_v40 }
  0xba   : > { %v603_v60 = vpop.permute.xlu0 %602  ;;  %v645_v20 = vmul.f32 %v2323_v12, %v608_v59 }
  0xbb   : > { %v644_v21 = vmul.f32 %v2323_v12, %v603_v60 }
  0xbc   : > { %v653_v29 = vadd.f32 %v645_v20, %v584_v25  ;;  %v1009_v25 = vld [vmem:[%s2783_s3 + $0x20] sm:$0xff] }
  0xbd   : > { %v618_v61 = vpop.permute.xlu1 %617  ;;  %v652_v30 = vadd.f32 %v644_v21, %v583_v24  ;;  %1873 = vmatprep.subr.mxu0 %v1009_v25 }
  0xbe   : > { %v613_v62 = vpop.permute.xlu0 %612  ;;  %v647_v41 = vmul.f32 %v2323_v12, %v618_v61  ;;  %1874 = vmatpush3.msra.mxu0 %v1009_v25 }
  0xbf   : > { %v646_v42 = vmul.f32 %v2323_v12, %v613_v62 }
  0xc0   : > { %v655_v54 = vadd.f32 %v647_v41, %v586_v46 }
  0xc1   : > { %v2294_v63 = vpop.permute.xlu1 %497  ;;  %v654_v55 = vadd.f32 %v646_v42, %v585_v47 }
  0xc2   : > { %v2296_v0 = vpop.permute.xlu0 %492 }
  0xc5   : > { %v2298_v1 = vpop.permute.xlu1 %558 }
  0xc6   : > { %v2300_v3 = vpop.permute.xlu0 %553  ;;  %v580_v16 = vmul.f32 %v2313_v10, %v2298_v1 }
  0xc7   : > { %v579_v17 = vmul.f32 %v2313_v10, %v2300_v3 }
  0xc9   : > { %v677_v4 = vpop.permute.xlu1 %676 }
  0xca   : > { %v672_v5 = vpop.permute.xlu0 %671  ;;  %v714_v26 = vmul.f32 %v2332_v19, %v677_v4 }
  0xcb   : > { %v713_v27 = vmul.f32 %v2332_v19, %v672_v5 }
  0xcc   : > { %v722_v35 = vadd.f32 %v714_v26, %v653_v29  ;;  %v519_v26 = vmul.f32 %v2318_v11, %v2294_v63 }
  0xcd   : > { %v2302_v6 = vpop.permute.xlu1 %507  ;;  %v721_v36 = vadd.f32 %v713_v27, %v652_v30  ;;  %v518_v27 = vmul.f32 %v2318_v11, %v2296_v0 }
  0xce   : > { %v2304_v7 = vpop.permute.xlu0 %502  ;;  %v588_v31 = vadd.f32 %v580_v16, %v519_v26 }
  0xcf   : > { %v587_v32 = vadd.f32 %v579_v17, %v518_v27 }
  0xd1   : > { %v2306_v8 = vpop.permute.xlu1 %568 }
  0xd2   : > { %v2308_v9 = vpop.permute.xlu0 %563 }
  0xd5   : > { %v687_v13 = vpop.permute.xlu1 %686 }
  0xd6   : > { %v682_v14 = vpop.permute.xlu0 %681  ;;  %v716_v48 = vmul.f32 %v2332_v19, %v687_v13 }
  0xd7   : > { %v715_v49 = vmul.f32 %v2332_v19, %v682_v14 }
  0xd8   : > { %v724_v58 = vadd.f32 %v716_v48, %v655_v54 }
  0xd9   : > { %v628_v22 = vpop.permute.xlu1 %627  ;;  %v723_v59 = vadd.f32 %v715_v49, %v654_v55 }
  0xda   : > { %v623_v23 = vpop.permute.xlu0 %622  ;;  %v649_v1 = vmul.f32 %v2323_v12, %v628_v22 }
  0xdb   : > { %v648_v3 = vmul.f32 %v2323_v12, %v623_v23 }
  0xdc   : > { %v657_v39 = vadd.f32 %v649_v1, %v588_v31 }
  0xdd   : > { %v746_v33 = vpop.permute.xlu1 %745  ;;  %v656_v40 = vadd.f32 %v648_v3, %v587_v32 }
  0xde   : > { %v741_v34 = vpop.permute.xlu0 %740  ;;  %v783_v37 = vmul.f32 %v2341_v28, %v746_v33  ;;  %v582_v33 = vmul.f32 %v2313_v10, %v2306_v8  ;;  %v1008_v8 = vld [vmem:[%s2783_s3 + $0x18] sm:$0xff] }
  0xdf   : > { %v782_v38 = vmul.f32 %v2341_v28, %v741_v34  ;;  %1875 = vmatprep.subr.mxu0 %v1008_v8 }
  0xe0   : > { %v791_v44 = vadd.f32 %v783_v37, %v722_v35  ;;  %v521_v37 = vmul.f32 %v2318_v11, %v2302_v6  ;;  %v1007_v6 = vld [vmem:[%s2783_s3 + $0x10] sm:$0xff]  ;;  %1876 = vmatpush3.msra.mxu0 %v1008_v8 }
  0xe1   : > { %v790_v45 = vadd.f32 %v782_v38, %v721_v36  ;;  %v2358_v50 = vpop.permute.xlu1 %637  ;;  %v581_v38 = vmul.f32 %v2313_v10, %v2308_v9  ;;  %v520_v9 = vmul.f32 %v2318_v11, %v2304_v7  ;;  %1877 = vmatprep.subr.mxu0 %v1007_v6  ;;  %v1006_v7 = vld [vmem:[%s2783_s3 + $0x8] sm:$0xff] }
  0xe2   : > { %v2360_v51 = vpop.permute.xlu0 %632  ;;  %v806_v52 = vadd.f32 %v2354_v43, %v791_v44  ;;  %v590_v10 = vadd.f32 %v582_v33, %v521_v37  ;;  %v651_v41 = vmul.f32 %v2323_v12, %v2358_v50  ;;  %1878 = vmatpush3.msra.mxu0 %v1007_v6 }
  0xe3   : > { %v805_v53 = vadd.f32 %v2354_v43, %v790_v45  ;;  %v650_v42 = vmul.f32 %v2323_v12, %v2360_v51  ;;  %v589_v11 = vadd.f32 %v581_v38, %v520_v9  ;;  %v1005_v51 = vld [vmem:[%s2783_s3] sm:$0xff]  ;;  %1879 = vmatprep.subr.mxu0 %v1006_v7  ;;  %s2006_s3 = scalar_lea.vmem %s2005_s2, 512 }
  0xe4   : > { %vm814_vm4 = vcmp.ge.f32.partialorder %v806_v52, 0.0  ;;  %v822_v56 = vmul.f32 0.1, %v806_v52  ;;  %v659_v55 = vadd.f32 %v651_v41, %v590_v10  ;;  %1880 = vmatpush3.msra.mxu0 %v1006_v7 }
  0xe5   : > { %vm813_vm5 = vcmp.ge.f32.partialorder %v805_v53, 0.0  ;;  %v821_v57 = vmul.f32 0.1, %v805_v53  ;;  %v756_v60 = vpop.permute.xlu1 %755  ;;  %1881 = vmatprep.subr.mxu0 %v1005_v51 }
  0xe6   : > { %v751_v61 = vpop.permute.xlu0 %750  ;;  %v2364_v62 = vsel %vm814_vm4, %v806_v52, %v822_v56  ;;  %v785_v5 = vmul.f32 %v2341_v28, %v756_v60  ;;  %v658_v56 = vadd.f32 %v650_v42, %v589_v11  ;;  %1882 = vmatpush3.msra.mxu0 %v1005_v51 }
  0xe7   : > { %v2366_v4 = vsel %vm813_vm5, %v805_v53, %v821_v57  ;;  %v784_v13 = vmul.f32 %v2341_v28, %v751_v61  ;;  %876 = vst.msk [vmem:[#allocation3 + $0xa] sm:$0xff] %vm874_vm3, %v2364_v62  ;;  %vm1233_vm5 = vcmask 392192  }
  0xe8   : > { %875 = vst.msk [vmem:[#allocation3 + $0x2] sm:$0xff] %vm874_vm3, %v2366_v4  ;;  %v793_v14 = vadd.f32 %v785_v5, %v724_v58 }
  0xe9   : > { %v792_v15 = vadd.f32 %v784_v13, %v723_v59  ;;  %v697_v18 = vpop.permute.xlu1 %696 }
  0xea   : > { %v692_v20 = vpop.permute.xlu0 %691  ;;  %v808_v21 = vadd.f32 %v2354_v43, %v793_v14  ;;  %v718_v22 = vmul.f32 %v2332_v19, %v697_v18 }
  0xeb   : > { %v807_v24 = vadd.f32 %v2354_v43, %v792_v15  ;;  %v717_v23 = vmul.f32 %v2332_v19, %v692_v20 }
  0xec   : > { %vm816_vm6 = vcmp.ge.f32.partialorder %v808_v21, 0.0  ;;  %v824_v29 = vmul.f32 0.1, %v808_v21  ;;  %v726_v46 = vadd.f32 %v718_v22, %v657_v39 }
  0xed   : > { %vm815_vm7 = vcmp.ge.f32.partialorder %v807_v24, 0.0  ;;  %v823_v30 = vmul.f32 0.1, %v807_v24  ;;  %v707_v34 = vpop.permute.xlu1 %706  ;;  %v725_v47 = vadd.f32 %v717_v23, %v656_v40 }
  0xee   : > { %v702_v63 = vpop.permute.xlu0 %701  ;;  %v2391_v35 = vsel %vm816_vm6, %v808_v21, %v824_v29  ;;  %v720_v50 = vmul.f32 %v2332_v19, %v707_v34 }
  0xef   : > { %v2393_v0 = vsel %vm815_vm7, %v807_v24, %v823_v30  ;;  %v891_v36 = vld [vmem:[#allocation3 + $0x1] ss:$2 sm:$0xff]  ;;  %878 = vst.msk [vmem:[#allocation3 + $0x1a] sm:$0xff] %vm874_vm3, %v2391_v35  ;;  %v899_v52 = vld [vmem:[#allocation3 + $0x2] ss:$2 sm:$0xff]  ;;  %v719_v12 = vmul.f32 %v2332_v19, %v702_v63 }
  0xf0   : > { %877 = vst.msk [vmem:[#allocation3 + $0x12] sm:$0xff] %vm874_vm3, %v2393_v0  ;;  %926 = vrot.lane.b32.xlu0 %v891_v36, %s2766_s17  ;;  %v907_v5 = vld [vmem:[#allocation3 + $0x3] ss:$2 sm:$0xff]  ;;  %v728_v14 = vadd.f32 %v720_v50, %v659_v55  ;;  %v883_v40 = vld [vmem:[#allocation3] ss:$2 sm:$0xff] }
  0xf1   : > { %v766_v44 = vpop.permute.xlu1 %765  ;;  %v727_v15 = vadd.f32 %v719_v12, %v658_v56 }
  0xf2   : > { %v761_v45 = vpop.permute.xlu0 %760  ;;  %v787_v48 = vmul.f32 %v2341_v28, %v766_v44 }
  0xf3   : > { %v786_v49 = vmul.f32 %v2341_v28, %v761_v45 }
  0xf4   : > { %942 = vrot.lane.b32.xlu0 %v899_v52, %s2151_s30  ;;  %v795_v53 = vadd.f32 %v787_v48, %v726_v46 }
  0xf5   : > { %v794_v54 = vadd.f32 %v786_v49, %v725_v47  ;;  %v776_v57 = vpop.permute.xlu1 %775 }
  0xf6   : > { %v771_v58 = vpop.permute.xlu0 %770  ;;  %v810_v59 = vadd.f32 %v2354_v43, %v795_v53  ;;  %v789_v60 = vmul.f32 %v2341_v28, %v776_v57 }
  0xf7   : > { %v809_v19 = vadd.f32 %v2354_v43, %v794_v54  ;;  %v788_v61 = vmul.f32 %v2341_v28, %v771_v58  ;;  %v893_v13 = vld [vmem:[#allocation3 + $0x11] ss:$2 sm:$0xff]  ;;  %v915_v24 = vld [vmem:[#allocation3 + $0x4] ss:$2 sm:$0xff] }
  0xf8   : > { %958 = vrot.lane.b32.xlu0 %v907_v5, %s2152_s19  ;;  %928 = vrot.lane.b32.xlu1 %v893_v13, %s2766_s17  ;;  %vm818_vm8 = vcmp.ge.f32.partialorder %v810_v59, 0.0  ;;  %v826_v16 = vmul.f32 0.1, %v810_v59  ;;  %v797_v18 = vadd.f32 %v789_v60, %v728_v14  ;;  %v901_v25 = vld [vmem:[#allocation3 + $0x12] ss:$2 sm:$0xff] }
  0xf9   : > { %vm817_vm9 = vcmp.ge.f32.partialorder %v809_v19, 0.0  ;;  %v825_v17 = vmul.f32 0.1, %v809_v19  ;;  %v796_v20 = vadd.f32 %v788_v61, %v727_v15  ;;  %v909_v29 = vld [vmem:[#allocation3 + $0x13] ss:$2 sm:$0xff] }
  0xfa   : > { %v2435_v21 = vsel %vm818_vm8, %v810_v59, %v826_v16  ;;  %v812_v26 = vadd.f32 %v2354_v43, %v797_v18  ;;  %v885_v47 = vld [vmem:[#allocation3 + $0x10] ss:$2 sm:$0xff] }
  0xfb   : > { %v2437_v28 = vsel %vm817_vm9, %v809_v19, %v825_v17  ;;  %880 = vst.msk [vmem:[#allocation3 + $0x2a] sm:$0xff] %vm874_vm3, %v2435_v21  ;;  %v811_v27 = vadd.f32 %v2354_v43, %v796_v20  ;;  %v1815_v17 = vld [vmem:[%s2784_s4] ss:$0 sm:$0xff] }
  0xfc   : > { %879 = vst.msk [vmem:[#allocation3 + $0x22] sm:$0xff] %vm874_vm3, %v2437_v28  ;;  %974 = vrot.lane.b32.xlu0 %v915_v24, %s2153_s20  ;;  %944 = vrot.lane.b32.xlu1 %v901_v25, %s2151_s30  ;;  %vm820_vm10 = vcmp.ge.f32.partialorder %v812_v26, 0.0  ;;  %v828_v1 = vmul.f32 0.1, %v812_v26 }
  0xfd   : > { %vm819_vm11 = vcmp.ge.f32.partialorder %v811_v27, 0.0  ;;  %v827_v3 = vmul.f32 0.1, %v811_v27 }
  0xfe   : > { %v2447_v30 = vsel %vm820_vm10, %v812_v26, %v828_v1  ;;  %vm869_vm10 = vcmask 523264  }
  0xff   : > { %v2449_v31 = vsel %vm819_vm11, %v811_v27, %v827_v3  ;;  %882 = vst.msk [vmem:[#allocation3 + $0x3a] sm:$0xff] %vm874_vm3, %v2447_v30 }
 0x100   : > { %960 = vrot.lane.b32.xlu1 %v909_v29, %s2152_s19  ;;  %881 = vst.msk [vmem:[#allocation3 + $0x32] sm:$0xff] %vm874_vm3, %v2449_v31  ;;  %v1224_v29 = vld [vmem:[%s2785_s5 + $0x20] sm:$0xff] }
 0x101   : > { %1891 = vmatprep.subr.mxu1 %v1224_v29 }
 0x102   : > { %1892 = vmatpush3.msra.mxu1 %v1224_v29 }
 0x103   : > { %v917_v43 = vld [vmem:[#allocation3 + $0x14] ss:$2 sm:$0xff]  ;;  %v895_v32 = vld [vmem:[#allocation3 + $0x21] ss:$2 sm:$0xff] }
 0x104   : > { %976 = vrot.lane.b32.xlu0 %v917_v43, %s2153_s20  ;;  %930 = vrot.lane.b32.xlu1 %v895_v32, %s2766_s17  ;;  %v903_v33 = vld [vmem:[#allocation3 + $0x22] ss:$2 sm:$0xff]  ;;  %v911_v63 = vld [vmem:[#allocation3 + $0x23] ss:$2 sm:$0xff] }
 0x105   : > { %v887_v54 = vld [vmem:[#allocation3 + $0x20] ss:$2 sm:$0xff]  ;;  %v1223_v43 = vld [vmem:[%s2785_s5 + $0x18] sm:$0xff] }
 0x106   : > { %v1222_v32 = vld [vmem:[%s2785_s5 + $0x10] sm:$0xff]  ;;  %1893 = vmatprep.subr.mxu1 %v1223_v43 }
 0x107   : > { %v897_v34 = vld [vmem:[#allocation3 + $0x31] ss:$2 sm:$0xff]  ;;  %v905_v22 = vld [vmem:[#allocation3 + $0x32] ss:$2 sm:$0xff]  ;;  %1894 = vmatpush3.msra.mxu1 %v1223_v43 }
 0x108   : > { %946 = vrot.lane.b32.xlu0 %v903_v33, %s2151_s30  ;;  %932 = vrot.lane.b32.xlu1 %v897_v34, %s2766_s17  ;;  %v919_v23 = vld [vmem:[#allocation3 + $0x24] ss:$2 sm:$0xff]  ;;  %v913_v36 = vld [vmem:[#allocation3 + $0x33] ss:$2 sm:$0xff]  ;;  %v921_v37 = vld [vmem:[#allocation3 + $0x34] ss:$2 sm:$0xff] }
 0x109   : > { %v889_v61 = vld [vmem:[#allocation3 + $0x30] ss:$2 sm:$0xff]  ;;  %1895 = vmatprep.subr.mxu1 %v1222_v32  ;;  %v1436_v43 = vld [vmem:[%s2786_s7 + $0x8] sm:$0xff] }
 0x10a   : > { %1896 = vmatpush3.msra.mxu1 %v1222_v32 }
 0x10c   : > { %962 = vrot.lane.b32.xlu0 %v911_v63, %s2152_s19  ;;  %948 = vrot.lane.b32.xlu1 %v905_v22, %s2151_s30 }
 0x110   : > { %978 = vrot.lane.b32.xlu0 %v919_v23, %s2153_s20  ;;  %964 = vrot.lane.b32.xlu1 %v913_v36, %s2152_s19  ;;  %v1221_v23 = vld [vmem:[%s2785_s5 + $0x8] sm:$0xff] }
 0x111   : > { %1897 = vmatprep.subr.mxu1 %v1221_v23 }
 0x112   : > { %1898 = vmatpush3.msra.mxu1 %v1221_v23 }
 0x114   : > { %980 = vrot.lane.b32.xlu1 %v921_v37, %s2153_s20 }
 0x162   : > { %v927_v38 = vpop.permute.xlu0 %926 }
 0x163   : > { %v986_v9 = vsel %vm874_vm3, %v883_v40, %v927_v38 }
 0x166   : > { %v943_v8 = vpop.permute.xlu0 %942 }
 0x167   : > { %v991_v10 = vsel %vm990_vm12, %v986_v9, %v943_v8 }
 0x16a   : > { %v929_v6 = vpop.permute.xlu1 %928  ;;  %v959_v39 = vpop.permute.xlu0 %958 }
 0x16b   : > { %v996_v41 = vsel %vm995_vm13, %v991_v10, %v959_v39  ;;  %v987_v48 = vsel %vm874_vm3, %v885_v47, %v929_v6  ;;  %v1220_v6 = vld [vmem:[%s2785_s5] sm:$0xff] }
 0x16c   : > { %1899 = vmatprep.subr.mxu1 %v1220_v6 }
 0x16d   : > { %1900 = vmatpush3.msra.mxu1 %v1220_v6 }
 0x16e   : > { %v945_v42 = vpop.permute.xlu1 %944  ;;  %v975_v44 = vpop.permute.xlu0 %974 }
 0x16f   : > { %v1001_v45 = vsel %vm1000_vm14, %v996_v41, %v975_v44  ;;  %v992_v49 = vsel %vm990_vm12, %v987_v48, %v945_v42 }
 0x170   : > { %1883 = vmatprep.mubr.msk.f32.mxu0 %vm1017_vm15, %v1001_v45 }
 0x172   : > { %v961_v46 = vpop.permute.xlu1 %960 }
 0x173   : > { %v997_v52 = vsel %vm995_vm13, %v992_v49, %v961_v46 }
 0x176   : > { %v931_v7 = vpop.permute.xlu1 %930  ;;  %v977_v11 = vpop.permute.xlu0 %976 }
 0x177   : > { %v1002_v50 = vsel %vm1000_vm14, %v997_v52, %v977_v11  ;;  %v988_v56 = vsel %vm874_vm3, %v887_v54, %v931_v7 }
 0x178   : > { %1884 = vmatmul.mubr.msk.f32.vlgmr.msra.gmra.mxu0 %vm1017_vm15, %v1002_v50 }
 0x17a   : > { %v947_v12 = vpop.permute.xlu0 %946  ;;  %v933_v51 = vpop.permute.xlu1 %932 }
 0x17b   : > { %v993_v57 = vsel %vm990_vm12, %v988_v56, %v947_v12  ;;  %v989_v5 = vsel %vm874_vm3, %v889_v61, %v933_v51 }
 0x17e   : > { %v963_v53 = vpop.permute.xlu0 %962  ;;  %v949_v55 = vpop.permute.xlu1 %948 }
 0x17f   : > { %v998_v58 = vsel %vm995_vm13, %v993_v57, %v963_v53  ;;  %v994_v13 = vsel %vm990_vm12, %v989_v5, %v949_v55  ;;  %v1440_v5 = vld [vmem:[%s2786_s7 + $0x28] sm:$0xff] }
 0x180   : > { %1907 = vmatprep.subr.mxu0 %v1440_v5  ;;  %1925 = vmatprep.subr.mxu1 %v1440_v5 }
 0x181   : > { %1908 = vmatpush3.msra.mxu0 %v1440_v5 }
 0x182   : > { %v979_v59 = vpop.permute.xlu0 %978  ;;  %v965_v19 = vpop.permute.xlu1 %964 }
 0x183   : > { %v1003_v60 = vsel %vm1000_vm14, %v998_v58, %v979_v59  ;;  %v999_v14 = vsel %vm995_vm13, %v994_v13, %v965_v19  ;;  %v1439_v13 = vld [vmem:[%s2786_s7 + $0x20] sm:$0xff] }
 0x184   : > { %1886 = vmatprep.mubr.msk.f32.mxu0 %vm1017_vm15, %v1003_v60  ;;  %1909 = vmatprep.subr.mxu0 %v1439_v13 }
 0x185   : > { %1910 = vmatpush3.msra.mxu0 %v1439_v13 }
 0x186   : > { %v981_v15 = vpop.permute.xlu1 %980 }
 0x187   : > { %v1004_v16 = vsel %vm1000_vm14, %v999_v14, %v981_v15  ;;  %v1820_v14 = vld [vmem:[%s2787_s6] ss:$0 sm:$0xff] }
 0x188   : > { %1887 = vmatmul.mubr.msk.f32.gmra.mxu0 %vm1017_vm15, %v1004_v16 }
 0x238   : > { %v1885_v18 = vpop.f32.mrf.mxu0 }
 0x239   : > { %v1102_v20 = vadd.f32 %v1885_v18, %v1815_v17 }
 0x23a   : > { %v1096_v24 = vpop.f32.mrf.mxu0 }
 0x23b   : > { %vm1116_vm1 = vcmp.ge.f32.partialorder %v1102_v20, 0.0  ;;  %v1120_v25 = vmul.f32 0.1, %v1102_v20  ;;  %v1097_v26 = vadd.f32 %v1815_v17, %v1096_v24 }
 0x23d   : > { %v2492_v27 = vsel %vm1116_vm1, %v1102_v20, %v1120_v25  ;;  %vm1115_vm2 = vcmp.ge.f32.partialorder %v1097_v26, 0.0  ;;  %v1119_v1 = vmul.f32 0.1, %v1097_v26  ;;  %v1437_v25 = vld [vmem:[%s2786_s7 + $0x10] sm:$0xff] }
 0x23e   : > { %1165 = vst.msk [vmem:[#allocation4 + $0x9] sm:$0xff] %vm990_vm12, %v2492_v27 }
 0x23f   : > { %v2496_v3 = vsel %vm1115_vm2, %v1097_v26, %v1119_v1 }
 0x240   : > { %1164 = vst.msk [vmem:[#allocation4 + $0x1] sm:$0xff] %vm990_vm12, %v2496_v3 }
 0x245   : > { %v1173_v33 = vld [vmem:[#allocation4 + $0x9] sm:$0xff] }
 0x246   : > { %1186 = vrot.lane.b32.xlu1 %v1173_v33, %s2151_s30 }
 0x247   : > { %v1172_v34 = vld [vmem:[#allocation4 + $0x1] sm:$0xff] }
 0x248   : > { %1184 = vrot.lane.b32.xlu0 %v1172_v34, %s2151_s30  ;;  %v1888_v63 = vpop.f32.mrf.mxu0  ;;  %v1176_v37 = vld [vmem:[#allocation4 + $0x2] sm:$0xff] }
 0x249   : > { %v1112_v22 = vadd.f32 %v1888_v63, %v1815_v17  ;;  %v1168_v47 = vld [vmem:[#allocation4] sm:$0xff]  ;;  %v1169_v12 = vld [vmem:[#allocation4 + $0x8] sm:$0xff] }
 0x24a   : > { %v1106_v36 = vpop.f32.mrf.mxu0 }
 0x24b   : > { %vm1118_vm3 = vcmp.ge.f32.partialorder %v1112_v22, 0.0  ;;  %v1122_v38 = vmul.f32 0.1, %v1112_v22  ;;  %v1107_v8 = vadd.f32 %v1815_v17, %v1106_v36  ;;  %v1438_v17 = vld [vmem:[%s2786_s7 + $0x18] sm:$0xff] }
 0x24c   : > { %1200 = vrot.lane.b32.xlu0 %v1176_v37, %s2153_s20  ;;  %1911 = vmatprep.subr.mxu0 %v1438_v17 }
 0x24d   : > { %v2521_v39 = vsel %vm1118_vm3, %v1112_v22, %v1122_v38  ;;  %vm1117_vm4 = vcmp.ge.f32.partialorder %v1107_v8, 0.0  ;;  %v1121_v40 = vmul.f32 0.1, %v1107_v8  ;;  %1912 = vmatpush3.msra.mxu0 %v1438_v17  ;;  %v1435_v22 = vld [vmem:[%s2786_s7] sm:$0xff] }
 0x24e   : > { %1167 = vst.msk [vmem:[#allocation4 + $0x19] sm:$0xff] %vm990_vm12, %v2521_v39  ;;  %1913 = vmatprep.subr.mxu0 %v1437_v25 }
 0x24f   : > { %v2525_v9 = vsel %vm1117_vm4, %v1107_v8, %v1121_v40  ;;  %1914 = vmatpush3.msra.mxu0 %v1437_v25 }
 0x250   : > { %1166 = vst.msk [vmem:[#allocation4 + $0x11] sm:$0xff] %vm990_vm12, %v2525_v9  ;;  %1915 = vmatprep.subr.mxu0 %v1436_v43 }
 0x251   : > { %1916 = vmatpush3.msra.mxu0 %v1436_v43 }
 0x252   : > { %1917 = vmatprep.subr.mxu0 %v1435_v22 }
 0x253   : > { %1918 = vmatpush3.msra.mxu0 %v1435_v22 }
 0x255   : > { %v1175_v10 = vld [vmem:[#allocation4 + $0x19] sm:$0xff] }
 0x256   : > { %1190 = vrot.lane.b32.xlu1 %v1175_v10, %s2151_s30  ;;  %v1179_v45 = vld [vmem:[#allocation4 + $0x1a] sm:$0xff] }
 0x257   : > { %v1174_v41 = vld [vmem:[#allocation4 + $0x11] sm:$0xff] }
 0x258   : > { %1188 = vrot.lane.b32.xlu0 %v1174_v41, %s2151_s30  ;;  %v1177_v42 = vld [vmem:[#allocation4 + $0xa] sm:$0xff]  ;;  %v1178_v44 = vld [vmem:[#allocation4 + $0x12] sm:$0xff] }
 0x259   : > { %v1170_v54 = vld [vmem:[#allocation4 + $0x10] sm:$0xff]  ;;  %v1171_v58 = vld [vmem:[#allocation4 + $0x18] sm:$0xff] }
 0x25a   : > { %1202 = vrot.lane.b32.xlu1 %v1177_v42, %s2153_s20 }
 0x25c   : > { %1204 = vrot.lane.b32.xlu0 %v1178_v44, %s2153_s20 }
 0x25e   : > { %1206 = vrot.lane.b32.xlu1 %v1179_v45, %s2153_s20 }
 0x2b8   : > { %v1187_v7 = vpop.permute.xlu1 %1186 }
 0x2b9   : > { %v1213_v51 = vsel %vm990_vm12, %v1169_v12, %v1187_v7 }
 0x2ba   : > { %v1185_v46 = vpop.permute.xlu0 %1184 }
 0x2bb   : > { %v1212_v48 = vsel %vm990_vm12, %v1168_v47, %v1185_v46 }
 0x2be   : > { %v1201_v49 = vpop.permute.xlu0 %1200 }
 0x2bf   : > { %v1216_v52 = vsel %vm1000_vm14, %v1212_v48, %v1201_v49 }
 0x2c0   : > { %1901 = vmatprep.mubr.msk.f32.mxu1 %vm1233_vm5, %v1216_v52 }
 0x2c8   : > { %v1191_v11 = vpop.permute.xlu1 %1190 }
 0x2c9   : > { %v1215_v19 = vsel %vm990_vm12, %v1171_v58, %v1191_v11 }
 0x2ca   : > { %v1189_v50 = vpop.permute.xlu0 %1188 }
 0x2cb   : > { %v1214_v56 = vsel %vm990_vm12, %v1170_v54, %v1189_v50 }
 0x2cc   : > { %v1203_v53 = vpop.permute.xlu1 %1202 }
 0x2cd   : > { %v1217_v55 = vsel %vm1000_vm14, %v1213_v51, %v1203_v53 }
 0x2ce   : > { %1902 = vmatmul.mubr.msk.f32.vlgmr.msra.gmra.mxu1 %vm1233_vm5, %v1217_v55  ;;  %v1205_v57 = vpop.permute.xlu0 %1204 }
 0x2cf   : > { %v1218_v59 = vsel %vm1000_vm14, %v1214_v56, %v1205_v57  ;;  %1931 = vmatpush3.msra.mxu1 %v1440_v5  ;;  %v2620_v56 = vld [vmem:[#allocation6] ss:$0 sm:$0xff] }
 0x2d0   : > { %v1207_v60 = vpop.permute.xlu1 %1206  ;;  %1904 = vmatprep.mubr.msk.f32.mxu1 %vm1233_vm5, %v1218_v59  ;;  %1926 = vmatprep.subr.mxu1 %v1439_v13 }
 0x2d1   : > { %v1219_v61 = vsel %vm1000_vm14, %v1215_v19, %v1207_v60  ;;  %1932 = vmatpush3.msra.mxu1 %v1439_v13 }
 0x2d2   : > { %1905 = vmatmul.mubr.msk.f32.gmra.mxu1 %vm1233_vm5, %v1219_v61  ;;  %1927 = vmatprep.subr.mxu1 %v1438_v17 }
 0x2d3   : > { %1933 = vmatpush3.msra.mxu1 %v1438_v17 }
 0x2d4   : > { %1928 = vmatprep.subr.mxu1 %v1437_v25 }
 0x2d5   : > { %1934 = vmatpush3.msra.mxu1 %v1437_v25 }
 0x2d6   : > { %1929 = vmatprep.subr.mxu1 %v1436_v43 }
 0x2d7   : > { %1935 = vmatpush3.msra.mxu1 %v1436_v43 }
 0x2d8   : > { %1930 = vmatprep.subr.mxu1 %v1435_v22 }
 0x2d9   : > { %1936 = vmatpush3.msra.mxu1 %v1435_v22 }
 0x38e   : > { %v1903_v15 = vpop.f32.mrf.mxu1 }
 0x38f   : > { %v1318_v16 = vadd.f32 %v1903_v15, %v1820_v14 }
 0x390   : > { %v1312_v18 = vpop.f32.mrf.mxu1 }
 0x391   : > { %vm1332_vm6 = vcmp.ge.f32.partialorder %v1318_v16, 0.0  ;;  %v1336_v20 = vmul.f32 0.1, %v1318_v16  ;;  %v1313_v24 = vadd.f32 %v1820_v14, %v1312_v18 }
 0x392   : > { %v1906_v26 = vpop.f32.mrf.mxu1 }
 0x393   : > { %v1340_v1 = vsel %vm1332_vm6, %v1318_v16, %v1336_v20  ;;  %vm1331_vm7 = vcmp.ge.f32.partialorder %v1313_v24, 0.0  ;;  %v1335_v2 = vmul.f32 0.1, %v1313_v24  ;;  %v1328_v29 = vadd.f32 %v1906_v26, %v1820_v14 }
 0x394   : > { %1380 = vst.msk [vmem:[#allocation5 + $0x9] sm:$0xff] %vm990_vm12, %v1340_v1  ;;  %v1322_v32 = vpop.f32.mrf.mxu1 }
 0x395   : > { %v1339_v33 = vsel %vm1331_vm7, %v1313_v24, %v1335_v2  ;;  %vm1334_vm8 = vcmp.ge.f32.partialorder %v1328_v29, 0.0  ;;  %v1338_v34 = vmul.f32 0.1, %v1328_v29  ;;  %v1323_v63 = vadd.f32 %v1820_v14, %v1322_v32 }
 0x396   : > { %1379 = vst.msk [vmem:[#allocation5 + $0x1] sm:$0xff] %vm990_vm12, %v1339_v33 }
 0x397   : > { %v1342_v23 = vsel %vm1334_vm8, %v1328_v29, %v1338_v34  ;;  %vm1333_vm9 = vcmp.ge.f32.partialorder %v1323_v63, 0.0  ;;  %v1337_v36 = vmul.f32 0.1, %v1323_v63 }
 0x398   : > { %1382 = vst.msk [vmem:[#allocation5 + $0x19] sm:$0xff] %vm990_vm12, %v1342_v23 }
 0x399   : > { %v1341_v37 = vsel %vm1333_vm9, %v1323_v63, %v1337_v36 }
 0x39a   : > { %1381 = vst.msk [vmem:[#allocation5 + $0x11] sm:$0xff] %vm990_vm12, %v1341_v37 }
 0x39b   : > { %v1388_v38 = vld [vmem:[#allocation5 + $0x9] sm:$0xff] }
 0x39c   : > { %1401 = vrot.lane.b32.xlu1 %v1388_v38, %s2151_s30 }
 0x39d   : > { %v1387_v8 = vld [vmem:[#allocation5 + $0x1] sm:$0xff] }
 0x39e   : > { %1399 = vrot.lane.b32.xlu0 %v1387_v8, %s2151_s30  ;;  %v1391_v40 = vld [vmem:[#allocation5 + $0x2] sm:$0xff] }
 0x39f   : > { %v1390_v6 = vld [vmem:[#allocation5 + $0x19] sm:$0xff] }
 0x3a0   : > { %1405 = vrot.lane.b32.xlu1 %v1390_v6, %s2151_s30  ;;  %v1394_v42 = vld [vmem:[#allocation5 + $0x1a] sm:$0xff] }
 0x3a1   : > { %v1392_v10 = vld [vmem:[#allocation5 + $0xa] sm:$0xff]  ;;  %v1393_v44 = vld [vmem:[#allocation5 + $0x12] sm:$0xff] }
 0x3a2   : > { %1415 = vrot.lane.b32.xlu0 %v1391_v40, %s2153_s20  ;;  %v1389_v41 = vld [vmem:[#allocation5 + $0x11] sm:$0xff] }
 0x3a3   : > { %v1385_v45 = vld [vmem:[#allocation5 + $0x10] sm:$0xff]  ;;  %v1386_v47 = vld [vmem:[#allocation5 + $0x18] sm:$0xff] }
 0x3a4   : > { %1417 = vrot.lane.b32.xlu1 %v1392_v10, %s2153_s20 }
 0x3a6   : > { %1403 = vrot.lane.b32.xlu0 %v1389_v41, %s2151_s30  ;;  %s2604_s30 = sand.u32 1, %s2138_s24  }
 0x3a7   : > { %s1804_s27 = sshll.u32 %s2604_s30, 3 }
 0x3a8   : > { %1421 = vrot.lane.b32.xlu1 %v1394_v42, %s2153_s20  ;;  %s2610_s18 = scalar_lea.vmem [#allocation7], %s1804_s27 }
 0x3aa   : > { %1419 = vrot.lane.b32.xlu0 %v1393_v44, %s2153_s20  ;;  %s1805_s20 = sshll.u32 %s2604_s30, 4 }
 0x3ab   : > { %s422_s17 = scalar_lea.vmem [#allocation9], %s1805_s20  ;;  %s429_s19 = scalar_lea.vmem [#allocation11], %s1805_s20 }
 0x3ac   : > { %s1620_s21 = sshll.u32 %s422_s17, 4  ;;  %s1636_s22 = sshll.u32 %s429_s19, 4  ;;  %s2615_s21 = int_to_ptr.vmem [resolvable:$true] %s1620_s21  ;;  %s2617_s22 = int_to_ptr.vmem [resolvable:$true] %s1636_s22 }
 0x3ad   : > { %s2000_s0 = scalar_lea.vmem %s2615_s21, 256  ;;  %p2007_p0 = scmp.lt.s32.totalorder %s2615_s21, %s2005_s2 }
 0x3ae   : > { %p2001_p11 = scmp.ne.s32.totalorder %s2615_s21, %s2000_s0  ;;  %p2008_p1 = scmp.lt.s32.totalorder %s2006_s3, %s2000_s0 }
 0x3b0   : > { %p2002_p12 = pnand %p2001_p11, %p2267_p5  ;;  %p2009_p2 = por %p2008_p1, %p2007_p0 }
 0x3b2   : > { %p2003_p13 = pneg %p2002_p12 }
 0x3b4   : > { %p2010_p3 = pnand %p2009_p2, %p2003_p13 }
 0x3c8   : > { %837 = vxpose.xlu0.b32.start [1/8] (short) (narrow) %v2366_v4, 8 }
 0x3cc   : > { %838 = vxpose.xlu0.b32.cont [2/8] (short) (narrow) %v2364_v62, 8 }
 0x3d0   : > { %839 = vxpose.xlu0.b32.cont [3/8] (short) (narrow) %v2393_v0, 8  ;;  %v1383_v0 = vld [vmem:[#allocation5] sm:$0xff] }
 0x3d1   : > { %1127 = vxpose.xlu1.b32.start [1/4] (short) (narrow) %v2496_v3, 16  ;;  %v1384_v3 = vld [vmem:[#allocation5 + $0x8] sm:$0xff] }
 0x3d4   : > { %840 = vxpose.xlu0.b32.cont [4/8] (short) (narrow) %v2391_v35, 8 }
 0x3d5   : > { %1128 = vxpose.xlu1.b32.cont [2/4] (short) (narrow) %v2492_v27, 16 }
 0x3d8   : > { %841 = vxpose.xlu0.b32.cont [5/8] (short) (narrow) %v2437_v28, 8 }
 0x3d9   : > { %1129 = vxpose.xlu1.b32.cont [3/4] (short) (narrow) %v2525_v9, 16 }
 0x3dc   : > { %842 = vxpose.xlu0.b32.cont [6/8] (short) (narrow) %v2435_v21, 8 }
 0x3dd   : > { %1130 = vxpose.xlu1.b32.end [4/4] (short) (narrow) %v2521_v39, 16 }
 0x3e0   : > { %843 = vxpose.xlu0.b32.cont [7/8] (short) (narrow) %v2449_v31, 8 }
 0x3e1   : > { %1343 = vxpose.xlu1.b32.start [1/4] (short) (narrow) %v1339_v33, 16 }
 0x3e4   : > { %844 = vxpose.xlu0.b32.end [8/8] (short) (narrow) %v2447_v30, 8 }
 0x3e5   : > { %1344 = vxpose.xlu1.b32.cont [2/4] (short) (narrow) %v1340_v1, 16 }
 0x3e9   : > { %1345 = vxpose.xlu1.b32.cont [3/4] (short) (narrow) %v1341_v37, 16 }
 0x3ed   : > { %1346 = vxpose.xlu1.b32.end [4/4] (short) (narrow) %v1342_v23, 16 }
 0x40e   : > { %v1402_v62 = vpop.permute.xlu1 %1401 }
 0x40f   : > { %v1428_v39 = vsel %vm990_vm12, %v1384_v3, %v1402_v62 }
 0x410   : > { %v1400_v4 = vpop.permute.xlu0 %1399 }
 0x411   : > { %v1427_v28 = vsel %vm990_vm12, %v1383_v0, %v1400_v4 }
 0x412   : > { %v1406_v35 = vpop.permute.xlu1 %1405 }
 0x413   : > { %v1430_v52 = vsel %vm990_vm12, %v1386_v47, %v1406_v35 }
 0x414   : > { %v1416_v27 = vpop.permute.xlu0 %1415 }
 0x415   : > { %v1431_v21 = vsel %vm1000_vm14, %v1427_v28, %v1416_v27 }
 0x416   : > { %v1418_v9 = vpop.permute.xlu1 %1417  ;;  %1919 = vmatprep.mubr.msk.f32.mxu0 %vm1233_vm5, %v1431_v21 }
 0x417   : > { %v1432_v30 = vsel %vm1000_vm14, %v1428_v39, %v1418_v9 }
 0x418   : > { %1920 = vmatmul.mubr.msk.f32.vlgmr.msra.gmra.mxu0 %vm1233_vm5, %v1432_v30  ;;  %v1404_v31 = vpop.permute.xlu0 %1403 }
 0x419   : > { %v1429_v48 = vsel %vm990_vm12, %v1385_v45, %v1404_v31 }
 0x41a   : > { %v1422_v46 = vpop.permute.xlu1 %1421 }
 0x41b   : > { %v1434_v11 = vsel %vm1000_vm14, %v1430_v52, %v1422_v46 }
 0x41c   : > { %v1420_v49 = vpop.permute.xlu0 %1419 }
 0x41d   : > { %v1433_v7 = vsel %vm1000_vm14, %v1429_v48, %v1420_v49 }
 0x41e   : > { %1922 = vmatprep.mubr.msk.f32.mxu1 %vm1233_vm5, %v1433_v7 }
 0x41f   : > { %1923 = vmatmul.mubr.msk.f32.vlgmr.msra.gmra.mxu1 %vm1233_vm5, %v1434_v11 }
 0x444   : > { %v853_v12 = vpop.trf.xlu0 }
 0x445   : > { %870 = vst.msk [vmem:[%s2610_s18] sm:$0xff] %vm869_vm10, %v853_v12 }
 0x44d   : > { %v1143_v50 = vpop.trf.xlu1 }
 0x44e   : > { %1159 = vst.msk [vmem:[%s422_s17] sm:$0xff] %vm1000_vm14, %v1143_v50 }
 0x451   : > { %v1144_v51 = vpop.trf.xlu1 }
 0x452   : > { %1160 = vst.msk [vmem:[%s422_s17 + $0x8] sm:$0xff] %vm1000_vm14, %v1144_v51  ;;  %s2629_s17 = scalar_lea.hbm %s2788_s10, %s2768_s16 }
 0x45d   : > { %v1359_v53 = vpop.trf.xlu1 }
 0x45e   : > { %1375 = vst.msk [vmem:[%s429_s19] sm:$0xff] %vm1000_vm14, %v1359_v53 }
 0x461   : > { %v1360_v54 = vpop.trf.xlu1 }
 0x462   : > { %1376 = vst.msk [vmem:[%s429_s19 + $0x8] sm:$0xff] %vm1000_vm14, %v1360_v54  ;;  %s2631_s19 = scalar_lea.sflag [#allocation10], %s1584_s29 }
 0x4d8   : > { %v1921_v55 = vpop.f32.mrf.mxu0 }
 0x4da   : > { %v1526_v57 = vpop.f32.mrf.mxu0 }
 0x4db   : > { %v1527_v58 = vadd.f32 %v2620_v56, %v1526_v57 }
 0x4dc   : > { %2013 = shalt.err (!%p2010_p3)
}
 0x4dd   : > { %s2014_s29 = scalar_lea.hbm %s2629_s17, 256  ;;  %s2018_s1 = scalar_lea.hbm %s2788_s10, 1024 }
 0x4de   : > { %p2015_p4 = scmp.ne.s32.totalorder %s2629_s17, %s2014_s29  ;;  %p2019_p9 = scmp.lt.s32.totalorder %s2629_s17, %s2788_s10 }
 0x4df   : > { %p2020_p10 = scmp.lt.s32.totalorder %s2018_s1, %s2014_s29 }
 0x4e0   : > { %p2016_p7 = pnand %p2015_p4, %p2267_p5 }
 0x4e1   : > { %p2021_p11 = por %p2020_p10, %p2019_p9 }
 0x4e2   : > { %p2017_p8 = pneg %p2016_p7 }
 0x4e4   : > { %p2022_p12 = pnand %p2021_p11, %p2017_p8 }
 0x4e6   : > { %2025 = shalt.err (!%p2022_p12)
}
 0x4e7   : > { %s2155_s0 = smov 128   ;;  %s2789_s2 = smov 8   ;;  %1545 = vxpose.xlu0.b32.start [1/4] (short) (narrow) %v1527_v58, 8  ;;  %v1532_v59 = vadd.f32 %v1921_v55, %v2620_v56  ;;  %v1924_v19 = vpop.f32.mrf.mxu1 }
 0x4e8   : > { %1938 = dma.vmem_to_hbm [thread:$0]  (%p2267_p5), %s2615_s21, 256, %s2629_s17, %s2631_s19, %s2155_s0, %s2155_s0, %s2789_s2  }
 0x4e9   : > { %s2790_s3 = sshll.u32 %s2248_s8, 8  ;;  %s1833_s20 = sshll.u32 %s2248_s8, 7 }
 0x4ea   : > { %s2662_s29 = scalar_lea.hbm %s2763_s11, %s2790_s3  ;;  %s1607_s27 = sshll.u32 %s2610_s18, 4  ;;  %s1608_s27 = int_to_ptr.vmem [resolvable:$true] %s1607_s27 }
 0x4eb   : > { %s1605_s6 = scalar_lea.hbm %s2761_s9, %s1833_s20  ;;  %s1580_s7 = scalar_lea.sflag [#allocation8], %s2604_s30 }
 0x4ec   : > { %s2026_s10 = scalar_lea.vmem %s1608_s27, 128  ;;  %s2156_s21 = smov [#allocation7]  }
 0x4ed   : > { %p2027_p13 = scmp.ne.s32.totalorder %s1608_s27, %s2026_s10  ;;  %s2030_s17 = sshll.u32 %s2156_s21, 4  ;;  %s2031_s17 = int_to_ptr.vmem [resolvable:$false] %s2030_s17 }
 0x4ee   : > { %s2032_s3 = scalar_lea.vmem %s2031_s17, 256  ;;  %p2033_p2 = scmp.lt.s32.totalorder %s1608_s27, %s2031_s17 }
 0x4ef   : > { %p2028_p0 = pnand %p2027_p13, %p2267_p5  ;;  %p2034_p3 = scmp.lt.s32.totalorder %s2032_s3, %s2026_s10 }
 0x4f1   : > { %p2029_p1 = pneg %p2028_p0  ;;  %p2035_p4 = por %p2034_p3, %p2033_p2 }
 0x4f3   : > { %p2036_p7 = pnand %p2035_p4, %p2029_p1 }
 0x4f5   : > { %2039 = shalt.err (!%p2036_p7)
}
 0x4f6   : > { %s2040_s18 = scalar_lea.hbm %s1605_s6, 128  ;;  %s2044_s16 = scalar_lea.hbm %s2761_s9, 512 }
 0x4f7   : > { %p2041_p8 = scmp.ne.s32.totalorder %s1605_s6, %s2040_s18  ;;  %p2045_p11 = scmp.lt.s32.totalorder %s1605_s6, %s2761_s9 }
 0x4f8   : > { %p2046_p12 = scmp.lt.s32.totalorder %s2044_s16, %s2040_s18 }
 0x4f9   : > { %p2042_p9 = pnand %p2041_p8, %p2267_p5 }
 0x4fa   : > { %p2047_p13 = por %p2046_p12, %p2045_p11 }
 0x4fb   : > { %p2043_p10 = pneg %p2042_p9 }
 0x4fd   : > { %p2048_p0 = pnand %p2047_p13, %p2043_p10 }
 0x4ff   : > { %2051 = shalt.err (!%p2048_p0)
}
 0x500   : > { %1937 = dma.vmem_to_hbm [thread:$0]  (%p2267_p5), %s1608_s27, 128, %s1605_s6, %s1580_s7   ;;  %1546 = vxpose.xlu0.b32.cont [2/4] (short) (narrow) %v1532_v59, 8  ;;  %v1536_v60 = vpop.f32.mrf.mxu1 }
 0x501   : > { %s2052_s10 = scalar_lea.vmem %s2617_s22, 256  ;;  %s2157_s21 = smov [#allocation11]  }
 0x502   : > { %p2053_p1 = scmp.ne.s32.totalorder %s2617_s22, %s2052_s10  ;;  %s2056_s17 = sshll.u32 %s2157_s21, 4  ;;  %s2057_s17 = int_to_ptr.vmem [resolvable:$false] %s2056_s17 }
 0x503   : > { %s2058_s3 = scalar_lea.vmem %s2057_s17, 512  ;;  %p2059_p4 = scmp.lt.s32.totalorder %s2617_s22, %s2057_s17 }
 0x504   : > { %p2054_p2 = pnand %p2053_p1, %p2267_p5  ;;  %p2060_p7 = scmp.lt.s32.totalorder %s2058_s3, %s2052_s10 }
 0x506   : > { %p2055_p3 = pneg %p2054_p2  ;;  %p2061_p8 = por %p2060_p7, %p2059_p4 }
 0x508   : > { %p2062_p9 = pnand %p2061_p8, %p2055_p3 }
 0x50a   : > { %2065 = shalt.err (!%p2062_p9)
}
 0x50b   : > { %s2066_s6 = scalar_lea.hbm %s2662_s29, 256  ;;  %s2070_s18 = scalar_lea.hbm %s2763_s11, 1024 }
 0x50c   : > { %p2067_p10 = scmp.ne.s32.totalorder %s2662_s29, %s2066_s6  ;;  %p2071_p13 = scmp.lt.s32.totalorder %s2662_s29, %s2763_s11 }
 0x50d   : > { %p2072_p0 = scmp.lt.s32.totalorder %s2070_s18, %s2066_s6 }
 0x50e   : > { %p2068_p11 = pnand %p2067_p10, %p2267_p5 }
 0x50f   : > { %p2073_p1 = por %p2072_p0, %p2071_p13 }
 0x510   : > { %p2069_p12 = pneg %p2068_p11 }
 0x512   : > { %p2074_p2 = pnand %p2073_p1, %p2069_p12 }
 0x514   : > { %2077 = shalt.err (!%p2074_p2)
}
 0x515   : > { %1939 = dma.vmem_to_hbm [thread:$0]  (%p2267_p5), %s2617_s22, 256, %s2662_s29, %s2631_s19, %s2155_s0, %s2155_s0, %s2789_s2   ;;  %v1537_v61 = vadd.f32 %v2620_v56, %v1536_v60  ;;  %v1542_v5 = vadd.f32 %v1924_v19, %v2620_v56  ;;  %vm1577_vm11 = vcmask 253952  }
 0x516   : > { %s1838_s16 = sshll.u32 %s2248_s8, 4  ;;  %s435_s20 = scalar_lea.vmem [#allocation12], %s2604_s30 }
 0x517   : > { %1547 = vxpose.xlu0.b32.cont [3/4] (short) (narrow) %v1537_v61, 8  ;;  %s1652_s1 = sshll.u32 %s435_s20, 4  ;;  %s2714_s17 = scalar_lea.hbm %s2764_s12, %s1838_s16  ;;  %s1653_s1 = int_to_ptr.vmem [resolvable:$true] %s1652_s1 }
 0x518   : > { %s1595_s22 = scalar_lea.sflag [#allocation13], %s2604_s30  ;;  %s2078_s19 = scalar_lea.vmem %s1653_s1, 16 }
 0x519   : > { %p2079_p3 = scmp.ne.s32.totalorder %s1653_s1, %s2078_s19  ;;  %s2158_s0 = smov [#allocation12]  }
 0x51a   : > { %s2082_s2 = sshll.u32 %s2158_s0, 4  ;;  %s2083_s2 = int_to_ptr.vmem [resolvable:$false] %s2082_s2 }
 0x51b   : > { %1548 = vxpose.xlu0.b32.end [4/4] (short) (narrow) %v1542_v5, 8  ;;  %p2080_p4 = pnand %p2079_p3, %p2267_p5  ;;  %s2084_s8 = scalar_lea.vmem %s2083_s2, 32 }
 0x51c   : > { %p2085_p8 = scmp.lt.s32.totalorder %s1653_s1, %s2083_s2  ;;  %p2086_p9 = scmp.lt.s32.totalorder %s2084_s8, %s2078_s19 }
 0x51d   : > { %p2081_p7 = pneg %p2080_p4 }
 0x51e   : > { %p2087_p10 = por %p2086_p9, %p2085_p8 }
 0x520   : > { %p2088_p11 = pnand %p2087_p10, %p2081_p7 }
 0x58b   : > { %v1561_v13 = vpop.trf.xlu0 }
 0x58c   : > { %1578 = vst.msk [vmem:[%s435_s20] sm:$0x1] %vm1577_vm11, %v1561_v13 }
 0x58d   : > { %2091 = shalt.err (!%p2088_p11)
}
 0x58e   : > { %s2092_s29 = scalar_lea.hbm %s2714_s17, 16  ;;  %s2096_s6 = scalar_lea.hbm %s2764_s12, 64 }
 0x58f   : > { %p2093_p12 = scmp.ne.s32.totalorder %s2714_s17, %s2092_s29  ;;  %p2097_p1 = scmp.lt.s32.totalorder %s2714_s17, %s2764_s12 }
 0x590   : > { %p2098_p2 = scmp.lt.s32.totalorder %s2096_s6, %s2092_s29 }
 0x591   : > { %p2094_p13 = pnand %p2093_p12, %p2267_p5 }
 0x592   : > { %p2099_p3 = por %p2098_p2, %p2097_p1 }
 0x593   : > { %p2095_p0 = pneg %p2094_p13 }
 0x595   : > { %p2100_p4 = pnand %p2099_p3, %p2095_p0 }
 0x597   : > { %2103 = shalt.err (!%p2100_p4)
}
 0x598   : > { %1940 = dma.vmem_to_hbm [thread:$0]  (%p2267_p5), %s1653_s1, 16, %s2714_s17, %s1595_s22  }
 0x599 PF: > { %p1958_p7 = scmp.ge.s32.totalorder %s2146_s26, 2  ;;  %s1664_s18 = sand.u32 1, %s2134_s23  }
 0x59a   : > { %s1665_s5 = scalar_lea.sflag [#allocation8], %s1664_s18 }
 0x59b   : > { %p1946_p8 = pnand %p1958_p7, %p2271_p6 }
 0x59d   : > { %p1947_p9 = pneg %p1946_p8 }
 0x59f   : > { %2121 = dma.done.wait (%p1947_p9), %s1665_s5, 128  }
 0x5a0   : > { %2123 = vsyncadd (%p1947_p9), %s1665_s5, 4294967168  ;;  %s2791_s4 = sadd.s32 4294967294, %s2146_s26  }
 0x5a1   : > { %s1673_s16 = sand.u32 1, %s2791_s4  }
 0x5a2   : > { %s1674_s20 = scalar_lea.sflag [#allocation10], %s1673_s16 }
 0x5a3   : > { %2125 = dma.done.wait (%p1947_p9), %s1674_s20, 512  }
 0x5a4   : > { %2127 = vsyncadd (%p1947_p9), %s1674_s20, 4294966784  ;;  %s1692_s14 = scalar_lea.sflag [#allocation13], %s1664_s18 }
 0x5a5   : > { %2129 = dma.done.wait (%p1947_p9), %s1692_s14, 16  }
 0x5a6   : > { %2131 = vsyncadd (%p1947_p9), %s1692_s14, 4294967280  ;;  %p31_p5 = scmp.ge.s32.totalorder %s2252_s28, 6   ;;  %s2792_s23 = smov %s2138_s24 }
 0x5a7   : > { %s2793_s24 = smov %s2142_s25  ;;  %s2794_s25 = smov %s2265_s13 }
 0x5a8   : > { %s2795_s26 = smov %s2252_s28  ;;  %33 = sbr.rel (!%p31_p5) target bundleno = 17 (0x11), region = 159 }
 0x5ad   :  { %1696 = vsyncpa [#allocation8], 1 }
 0x5ae   :  { %1698 = vsyncpa [#allocation8 + $0x1], 1 }
 0x5af   :  { %1699 = vsyncpa [#allocation10], 1 }
 0x5b0   :  { %1701 = vsyncpa [#allocation10 + $0x1], 1 }
 0x5b1   :  { %1702 = vsyncpa [#allocation13], 1 }
 0x5b2   :  { %1704 = vsyncpa [#allocation13 + $0x1], 1 }

</bundles_post_ra>
